<compile_context>
chip_gen: v7x
topology: tpu7x:2x2x1
jax: 0.10.0
libtpu: 0.0.40
codegen_flags: <defaults>
</compile_context>

<pallas_src>
import functools
import math

import jax
import jax.numpy as jnp
from jax.experimental import pallas as pl
from jax.experimental.pallas import tpu as pltpu


def _flash_sdpa_kernel(q_ref, k_ref, v_ref, o_ref, qs_sc, m_sc, l_sc, acc_sc, *,
                       scale, is_causal, sk, tq, tk, g, dh):
    # q_ref: (1, tq, g*dh), k_ref/v_ref: (1, tk, g*dh), o_ref: (1, tq, g*dh)
    # qs_sc: (g, tq, dh) native dtype (scaled, head-split Q, filled once per q tile)
    # m_sc/l_sc: (g, tq, 1) f32, acc_sc: (g, tq, dh) f32
    ki = pl.program_id(3)
    nk = pl.num_programs(3)
    q_start = pl.program_id(2) * tq
    k_start = ki * tk
    need_key_mask = (sk % tk) != 0

    @pl.when(ki == 0)
    def _init():
        m_sc[...] = jnp.full(m_sc.shape, -jnp.inf, jnp.float32)
        l_sc[...] = jnp.zeros(l_sc.shape, jnp.float32)
        acc_sc[...] = jnp.zeros(acc_sc.shape, jnp.float32)
        # Hoist per-q-tile work out of the k loop: split the packed lane slab into a leading
        # head axis (static lane-window slices, no wrapper-side HBM transposes) and fold the
        # softmax scale into Q once, in its native dtype.
        q2 = q_ref[0] * scale                                                   # (tq, g*dh)
        qs_sc[...] = jnp.stack([q2[:, h * dh:(h + 1) * dh] for h in range(g)], axis=0)

    def _compute():
        k2 = k_ref[0]   # (tk, g*dh), native dtype
        v2 = v_ref[0]   # (tk, g*dh)

        kh = jnp.stack([k2[:, h * dh:(h + 1) * dh] for h in range(g)], axis=0)  # (g, tk, dh)
        vh = jnp.stack([v2[:, h * dh:(h + 1) * dh] for h in range(g)], axis=0)  # (g, tk, dh)

        if need_key_mask:
            # Zero padded key rows of V so masked (zero) probabilities cannot pick up
            # NaN/garbage from the padded block region.
            vcols = k_start + jax.lax.broadcasted_iota(jnp.int32, (g, tk, dh), 1)
            vh = jnp.where(vcols < sk, vh, jnp.zeros_like(vh))

        # scores (g, tq, tk): contract head_dim, batch over heads; native-dtype operands,
        # f32 accumulation on the MXU. Scale was already folded into Q.
        s = jax.lax.dot_general(
            qs_sc[...], kh,
            dimension_numbers=(((2,), (2,)), ((0,), (0,))),
            preferred_element_type=jnp.float32,
        )

        if is_causal or need_key_mask:
            rows = q_start + jax.lax.broadcasted_iota(jnp.int32, (g, tq, tk), 1)
            cols = k_start + jax.lax.broadcasted_iota(jnp.int32, (g, tq, tk), 2)
            if is_causal and need_key_mask:
                mask = jnp.logical_and(cols <= rows, cols < sk)
            elif is_causal:
                mask = cols <= rows  # PyTorch is_causal uses a top-left tril(L, S) mask
            else:
                mask = cols < sk
            s = jnp.where(mask, s, -1e30)

        m_prev = m_sc[...]                                               # (g, tq, 1)
        m_new = jnp.maximum(m_prev, jnp.max(s, axis=-1, keepdims=True))  # (g, tq, 1)
        alpha = jnp.exp(m_prev - m_new)                                  # (g, tq, 1)
        p = jnp.exp(s - m_new)                                           # (g, tq, tk) f32

        l_sc[...] = alpha * l_sc[...] + jnp.sum(p, axis=-1, keepdims=True)

        # PV: (g, tq, tk) x (g, tk, dh) -> (g, tq, dh); p cast to V's dtype before the MXU.
        pv = jax.lax.dot_general(
            p.astype(v_ref.dtype), vh,
            dimension_numbers=(((2,), (1,)), ((0,), (0,))),
            preferred_element_type=jnp.float32,
        )
        acc_sc[...] = alpha * acc_sc[...] + pv
        m_sc[...] = m_new

    if is_causal:
        # Skip k tiles that lie entirely above the causal diagonal for this q tile.
        @pl.when(k_start <= q_start + (tq - 1))
        def _():
            _compute()
    else:
        _compute()

    @pl.when(ki == nk - 1)
    def _finalize():
        inv_l = pl.reciprocal(l_sc[...], approx=False)       # (g, tq, 1), one rcp per row
        normalized = acc_sc[...] * inv_l                      # (g, tq, dh) f32
        # Merge heads back into a single lane-dense (tq, g*dh) slab and store once.
        merged = jnp.concatenate([normalized[h] for h in range(g)], axis=-1)
        o_ref[0] = merged.astype(o_ref.dtype)


def scaled_dot_product_attention_pallas(query, key, value, *, num_heads=1, is_causal=False,
                                         q_tile=256, k_tile=256):
    """Equivalent of ScaledDotProductAttention(num_heads=..., is_causal=...)(query, key, value).

    query: (B, Sq, E), key/value: (B, Sk, E)  ->  (B, Sq, E)
    """
    B, Sq, E = query.shape
    _, Sk, _ = key.shape
    assert E % num_heads == 0, "embedding_dim must be divisible by num_heads"
    dh = E // num_heads

    # Group heads so the last-dim block is lane-dense and layout-legal:
    # smallest g dividing num_heads with g*dh a multiple of 128, else all heads (full E block).
    G = num_heads
    for cand in range(1, num_heads + 1):
        if num_heads % cand == 0 and (cand * dh) % 128 == 0:
            G = cand
            break
    eg = G * dh                      # block width along E (multiple of 128, or == E)
    n_hg = num_heads // G

    def pick_tile(s, target):
        return s if s <= target else target   # target is a multiple of 8

    tq = pick_tile(Sq, q_tile)
    tk = pick_tile(Sk, k_tile)
    n_q = pl.cdiv(Sq, tq)
    n_k = pl.cdiv(Sk, tk)

    kernel = functools.partial(
        _flash_sdpa_kernel,
        scale=1.0 / math.sqrt(dh), is_causal=is_causal,
        sk=Sk, tq=tq, tk=tk, g=G, dh=dh,
    )

    itemsize = jnp.dtype(query.dtype).itemsize
    cost = pl.CostEstimate(
        flops=4 * B * num_heads * Sq * Sk * dh,          # QK^T + PV
        transcendentals=B * num_heads * Sq * Sk,          # exp
        bytes_accessed=(query.size + key.size + value.size + query.size) * itemsize,
    )

    return pl.pallas_call(
        kernel,
        out_shape=jax.ShapeDtypeStruct((B, Sq, E), query.dtype),
        grid_spec=pltpu.PrefetchScalarGridSpec(
            num_scalar_prefetch=0,
            grid=(B, n_hg, n_q, n_k),
            in_specs=[
                pl.BlockSpec((1, tq, eg), lambda b, hg, qi, ki: (b, qi, hg)),
                pl.BlockSpec((1, tk, eg), lambda b, hg, qi, ki: (b, ki, hg)),
                pl.BlockSpec((1, tk, eg), lambda b, hg, qi, ki: (b, ki, hg)),
            ],
            out_specs=pl.BlockSpec((1, tq, eg), lambda b, hg, qi, ki: (b, qi, hg)),
            scratch_shapes=[
                pltpu.VMEM((G, tq, dh), query.dtype),   # scaled, head-split Q (per q tile)
                pltpu.VMEM((G, tq, 1), jnp.float32),    # running max
                pltpu.VMEM((G, tq, 1), jnp.float32),    # running denominator
                pltpu.VMEM((G, tq, dh), jnp.float32),   # output accumulator
            ],
        ),
        compiler_params=pltpu.CompilerParams(
            dimension_semantics=("parallel", "parallel", "parallel", "arbitrary"),
        ),
        cost_estimate=cost,
    )(query, key, value)


def _reference_sdpa(query, key, value, *, num_heads, is_causal=False):
    B, Sq, E = query.shape
    _, Sk, _ = key.shape
    dh = E // num_heads
    q = query.reshape(B, Sq, num_heads, dh).transpose(0, 2, 1, 3)
    k = key.reshape(B, Sk, num_heads, dh).transpose(0, 2, 1, 3)
    v = value.reshape(B, Sk, num_heads, dh).transpose(0, 2, 1, 3)
    s = jnp.einsum("bhqd,bhkd->bhqk", q, k) / math.sqrt(dh)
    if is_causal:
        mask = jnp.tril(jnp.ones((Sq, Sk), dtype=bool))
        s = jnp.where(mask, s, -jnp.inf)
    p = jax.nn.softmax(s, axis=-1)
    o = jnp.einsum("bhqk,bhkd->bhqd", p, v)
    return o.transpose(0, 2, 1, 3).reshape(B, Sq, E)


def _check(query, key_t, value, num_heads, is_causal, **tile_kwargs):
    out = scaled_dot_product_attention_pallas(
        query, key_t, value, num_heads=num_heads, is_causal=is_causal, **tile_kwargs)
    out = jax.block_until_ready(out)
    ref = _reference_sdpa(query, key_t, value, num_heads=num_heads, is_causal=is_causal)
    assert out.shape == ref.shape, (out.shape, ref.shape)
    err = float(jnp.max(jnp.abs(out - ref)))
    assert jnp.allclose(out, ref, atol=2e-5, rtol=2e-5), err
    return out


if __name__ == "__main__":
    # Shapes from the module docstring example: batch=2, seq=10, embedding_dim=128, num_heads=8.
    B, S, E, H = 2, 10, 128, 8
    key0 = jax.random.PRNGKey(0)
    kq, kk, kv = jax.random.split(key0, 3)
    query = jax.random.normal(kq, (B, S, E), dtype=jnp.float32)
    key_t = jax.random.normal(kk, (B, S, E), dtype=jnp.float32)
    value = jax.random.normal(kv, (B, S, E), dtype=jnp.float32)

    # Non-causal and causal, single-tile path.
    _check(query, key_t, value, H, is_causal=False)
    _check(query, key_t, value, H, is_causal=True)

    # Multi-tile path (exercises the online-softmax accumulation, causal tile skipping,
    # and padded-key masking): Sq=Sk=12 with 8-wide q/k tiles.
    S2 = 12
    kq2, kk2, kv2 = jax.random.split(jax.random.PRNGKey(0), 3)
    q2 = jax.random.normal(kq2, (1, S2, E), dtype=jnp.float32)
    k2 = jax.random.normal(kk2, (1, S2, E), dtype=jnp.float32)
    v2 = jax.random.normal(kv2, (1, S2, E), dtype=jnp.float32)
    _check(q2, k2, v2, H, is_causal=False, q_tile=8, k_tile=8)
    _check(q2, k2, v2, H, is_causal=True, q_tile=8, k_tile=8)

    print("KERNEL_OK")
</pallas_src>

<mosaic_0001>
module attributes {stable_mosaic.version = 11 : i64} {
  func.func @_flash_sdpa_kernel(%arg0: i32, %arg1: i32, %arg2: i32, %arg3: i32, %arg4: memref<1x10x128xf32, #tpu.memory_space<vmem>>, %arg5: memref<1x10x128xf32, #tpu.memory_space<vmem>>, %arg6: memref<1x10x128xf32, #tpu.memory_space<vmem>>, %arg7: memref<1x10x128xf32, #tpu.memory_space<vmem>>, %arg8: memref<8x10x16xf32, #tpu.memory_space<vmem>>, %arg9: memref<8x10x1xf32, #tpu.memory_space<vmem>>, %arg10: memref<8x10x1xf32, #tpu.memory_space<vmem>>, %arg11: memref<8x10x16xf32, #tpu.memory_space<vmem>>) attributes {dimension_semantics = [#tpu.dimension_semantics<parallel>, #tpu.dimension_semantics<parallel>, #tpu.dimension_semantics<parallel>, #tpu.dimension_semantics<arbitrary>], iteration_bounds = array<i64: 2, 1, 1, 1>, scalar_prefetch = 0 : i64, scratch_operands = 4 : i64, tpu.core_type = #tpu.core_type<tc>, window_params = [{transform_indices = @transform_0, window_bounds = array<i64: 1, 10, 128>}, {transform_indices = @transform_1, window_bounds = array<i64: 1, 10, 128>}, {transform_indices = @transform_2, window_bounds = array<i64: 1, 10, 128>}, {transform_indices = @transform_3, window_bounds = array<i64: 1, 10, 128>}]} {
    %c0_i32 = arith.constant 0 : i32
    %0 = arith.cmpi eq, %arg3, %c0_i32 : i32
    %1 = arith.extui %0 : i1 to i32
    %c0_i32_0 = arith.constant 0 : i32
    %2 = arith.cmpi ne, %1, %c0_i32_0 : i32
    scf.if %2 {
      %cst_32 = arith.constant 0xFF800000 : f32
      %68 = vector.broadcast %cst_32 : f32 to vector<8x10x1xf32>
      %c0_33 = arith.constant 0 : index
      %c0_34 = arith.constant 0 : index
      %c0_35 = arith.constant 0 : index
      %69 = vector.load %arg9[%c0_33, %c0_34, %c0_35] : memref<8x10x1xf32, #tpu.memory_space<vmem>>, vector<8x10x1xf32>
      tpu.vector_store %arg9[%c0_33, %c0_34, %c0_35], %68 {strides = array<i32>} : memref<8x10x1xf32, #tpu.memory_space<vmem>>, vector<8x10x1xf32>,
      %cst_36 = arith.constant 0.000000e+00 : f32
      %70 = vector.broadcast %cst_36 : f32 to vector<8x10x1xf32>
      %c0_37 = arith.constant 0 : index
      %c0_38 = arith.constant 0 : index
      %c0_39 = arith.constant 0 : index
      %71 = vector.load %arg10[%c0_37, %c0_38, %c0_39] : memref<8x10x1xf32, #tpu.memory_space<vmem>>, vector<8x10x1xf32>
      tpu.vector_store %arg10[%c0_37, %c0_38, %c0_39], %70 {strides = array<i32>} : memref<8x10x1xf32, #tpu.memory_space<vmem>>, vector<8x10x1xf32>,
      %cst_40 = arith.constant 0.000000e+00 : f32
      %72 = vector.broadcast %cst_40 : f32 to vector<8x10x16xf32>
      %c0_41 = arith.constant 0 : index
      %c0_42 = arith.constant 0 : index
      %c0_43 = arith.constant 0 : index
      %73 = vector.load %arg11[%c0_41, %c0_42, %c0_43] : memref<8x10x16xf32, #tpu.memory_space<vmem>>, vector<8x10x16xf32>
      tpu.vector_store %arg11[%c0_41, %c0_42, %c0_43], %72 {strides = array<i32>} : memref<8x10x16xf32, #tpu.memory_space<vmem>>, vector<8x10x16xf32>,
      %c0_44 = arith.constant 0 : index
      %c0_45 = arith.constant 0 : index
      %c0_46 = arith.constant 0 : index
      %74 = vector.load %arg4[%c0_44, %c0_45, %c0_46] : memref<1x10x128xf32, #tpu.memory_space<vmem>>, vector<1x10x128xf32>
      %75 = vector.shape_cast %74 : vector<1x10x128xf32> to vector<10x128xf32>
      %cst_47 = arith.constant 2.500000e-01 : f32
      %76 = vector.broadcast %cst_47 : f32 to vector<10x128xf32>
      %77 = arith.mulf %75, %76 : vector<10x128xf32>
      %78 = vector.extract_strided_slice %77 {offsets = [0, 0], sizes = [10, 16], strides = [1, 1]} : vector<10x128xf32> to vector<10x16xf32>
      %79 = vector.extract_strided_slice %77 {offsets = [0, 16], sizes = [10, 16], strides = [1, 1]} : vector<10x128xf32> to vector<10x16xf32>
      %80 = vector.extract_strided_slice %77 {offsets = [0, 32], sizes = [10, 16], strides = [1, 1]} : vector<10x128xf32> to vector<10x16xf32>
      %81 = vector.extract_strided_slice %77 {offsets = [0, 48], sizes = [10, 16], strides = [1, 1]} : vector<10x128xf32> to vector<10x16xf32>
      %82 = vector.extract_strided_slice %77 {offsets = [0, 64], sizes = [10, 16], strides = [1, 1]} : vector<10x128xf32> to vector<10x16xf32>
      %83 = vector.extract_strided_slice %77 {offsets = [0, 80], sizes = [10, 16], strides = [1, 1]} : vector<10x128xf32> to vector<10x16xf32>
      %84 = vector.extract_strided_slice %77 {offsets = [0, 96], sizes = [10, 16], strides = [1, 1]} : vector<10x128xf32> to vector<10x16xf32>
      %85 = vector.extract_strided_slice %77 {offsets = [0, 112], sizes = [10, 16], strides = [1, 1]} : vector<10x128xf32> to vector<10x16xf32>
      %86 = vector.shape_cast %78 : vector<10x16xf32> to vector<1x10x16xf32>
      %87 = vector.shape_cast %79 : vector<10x16xf32> to vector<1x10x16xf32>
      %88 = vector.shape_cast %80 : vector<10x16xf32> to vector<1x10x16xf32>
      %89 = vector.shape_cast %81 : vector<10x16xf32> to vector<1x10x16xf32>
      %90 = vector.shape_cast %82 : vector<10x16xf32> to vector<1x10x16xf32>
      %91 = vector.shape_cast %83 : vector<10x16xf32> to vector<1x10x16xf32>
      %92 = vector.shape_cast %84 : vector<10x16xf32> to vector<1x10x16xf32>
      %93 = vector.shape_cast %85 : vector<10x16xf32> to vector<1x10x16xf32>
      %94 = tpu.concatenate %86, %87, %88, %89, %90, %91, %92, %93 in 0 : vector<1x10x16xf32>, vector<1x10x16xf32>, vector<1x10x16xf32>, vector<1x10x16xf32>, vector<1x10x16xf32>, vector<1x10x16xf32>, vector<1x10x16xf32>, vector<1x10x16xf32> -> vector<8x10x16xf32>
      %c0_48 = arith.constant 0 : index
      %c0_49 = arith.constant 0 : index
      %c0_50 = arith.constant 0 : index
      %95 = vector.load %arg8[%c0_48, %c0_49, %c0_50] : memref<8x10x16xf32, #tpu.memory_space<vmem>>, vector<8x10x16xf32>
      tpu.vector_store %arg8[%c0_48, %c0_49, %c0_50], %94 {strides = array<i32>} : memref<8x10x16xf32, #tpu.memory_space<vmem>>, vector<8x10x16xf32>,
    } else {
    }
    %c0 = arith.constant 0 : index
    %c0_1 = arith.constant 0 : index
    %c0_2 = arith.constant 0 : index
    %3 = vector.load %arg5[%c0, %c0_1, %c0_2] : memref<1x10x128xf32, #tpu.memory_space<vmem>>, vector<1x10x128xf32>
    %4 = vector.shape_cast %3 : vector<1x10x128xf32> to vector<10x128xf32>
    %c0_3 = arith.constant 0 : index
    %c0_4 = arith.constant 0 : index
    %c0_5 = arith.constant 0 : index
    %5 = vector.load %arg6[%c0_3, %c0_4, %c0_5] : memref<1x10x128xf32, #tpu.memory_space<vmem>>, vector<1x10x128xf32>
    %6 = vector.shape_cast %5 : vector<1x10x128xf32> to vector<10x128xf32>
    %7 = vector.extract_strided_slice %4 {offsets = [0, 0], sizes = [10, 16], strides = [1, 1]} : vector<10x128xf32> to vector<10x16xf32>
    %8 = vector.extract_strided_slice %4 {offsets = [0, 16], sizes = [10, 16], strides = [1, 1]} : vector<10x128xf32> to vector<10x16xf32>
    %9 = vector.extract_strided_slice %4 {offsets = [0, 32], sizes = [10, 16], strides = [1, 1]} : vector<10x128xf32> to vector<10x16xf32>
    %10 = vector.extract_strided_slice %4 {offsets = [0, 48], sizes = [10, 16], strides = [1, 1]} : vector<10x128xf32> to vector<10x16xf32>
    %11 = vector.extract_strided_slice %4 {offsets = [0, 64], sizes = [10, 16], strides = [1, 1]} : vector<10x128xf32> to vector<10x16xf32>
    %12 = vector.extract_strided_slice %4 {offsets = [0, 80], sizes = [10, 16], strides = [1, 1]} : vector<10x128xf32> to vector<10x16xf32>
    %13 = vector.extract_strided_slice %4 {offsets = [0, 96], sizes = [10, 16], strides = [1, 1]} : vector<10x128xf32> to vector<10x16xf32>
    %14 = vector.extract_strided_slice %4 {offsets = [0, 112], sizes = [10, 16], strides = [1, 1]} : vector<10x128xf32> to vector<10x16xf32>
    %15 = vector.shape_cast %7 : vector<10x16xf32> to vector<1x10x16xf32>
    %16 = vector.shape_cast %8 : vector<10x16xf32> to vector<1x10x16xf32>
    %17 = vector.shape_cast %9 : vector<10x16xf32> to vector<1x10x16xf32>
    %18 = vector.shape_cast %10 : vector<10x16xf32> to vector<1x10x16xf32>
    %19 = vector.shape_cast %11 : vector<10x16xf32> to vector<1x10x16xf32>
    %20 = vector.shape_cast %12 : vector<10x16xf32> to vector<1x10x16xf32>
    %21 = vector.shape_cast %13 : vector<10x16xf32> to vector<1x10x16xf32>
    %22 = vector.shape_cast %14 : vector<10x16xf32> to vector<1x10x16xf32>
    %23 = tpu.concatenate %15, %16, %17, %18, %19, %20, %21, %22 in 0 : vector<1x10x16xf32>, vector<1x10x16xf32>, vector<1x10x16xf32>, vector<1x10x16xf32>, vector<1x10x16xf32>, vector<1x10x16xf32>, vector<1x10x16xf32>, vector<1x10x16xf32> -> vector<8x10x16xf32>
    %24 = vector.extract_strided_slice %6 {offsets = [0, 0], sizes = [10, 16], strides = [1, 1]} : vector<10x128xf32> to vector<10x16xf32>
    %25 = vector.extract_strided_slice %6 {offsets = [0, 16], sizes = [10, 16], strides = [1, 1]} : vector<10x128xf32> to vector<10x16xf32>
    %26 = vector.extract_strided_slice %6 {offsets = [0, 32], sizes = [10, 16], strides = [1, 1]} : vector<10x128xf32> to vector<10x16xf32>
    %27 = vector.extract_strided_slice %6 {offsets = [0, 48], sizes = [10, 16], strides = [1, 1]} : vector<10x128xf32> to vector<10x16xf32>
    %28 = vector.extract_strided_slice %6 {offsets = [0, 64], sizes = [10, 16], strides = [1, 1]} : vector<10x128xf32> to vector<10x16xf32>
    %29 = vector.extract_strided_slice %6 {offsets = [0, 80], sizes = [10, 16], strides = [1, 1]} : vector<10x128xf32> to vector<10x16xf32>
    %30 = vector.extract_strided_slice %6 {offsets = [0, 96], sizes = [10, 16], strides = [1, 1]} : vector<10x128xf32> to vector<10x16xf32>
    %31 = vector.extract_strided_slice %6 {offsets = [0, 112], sizes = [10, 16], strides = [1, 1]} : vector<10x128xf32> to vector<10x16xf32>
    %32 = vector.shape_cast %24 : vector<10x16xf32> to vector<1x10x16xf32>
    %33 = vector.shape_cast %25 : vector<10x16xf32> to vector<1x10x16xf32>
    %34 = vector.shape_cast %26 : vector<10x16xf32> to vector<1x10x16xf32>
    %35 = vector.shape_cast %27 : vector<10x16xf32> to vector<1x10x16xf32>
    %36 = vector.shape_cast %28 : vector<10x16xf32> to vector<1x10x16xf32>
    %37 = vector.shape_cast %29 : vector<10x16xf32> to vector<1x10x16xf32>
    %38 = vector.shape_cast %30 : vector<10x16xf32> to vector<1x10x16xf32>
    %39 = vector.shape_cast %31 : vector<10x16xf32> to vector<1x10x16xf32>
    %40 = tpu.concatenate %32, %33, %34, %35, %36, %37, %38, %39 in 0 : vector<1x10x16xf32>, vector<1x10x16xf32>, vector<1x10x16xf32>, vector<1x10x16xf32>, vector<1x10x16xf32>, vector<1x10x16xf32>, vector<1x10x16xf32>, vector<1x10x16xf32> -> vector<8x10x16xf32>
    %c0_6 = arith.constant 0 : index
    %c0_7 = arith.constant 0 : index
    %c0_8 = arith.constant 0 : index
    %41 = vector.load %arg8[%c0_6, %c0_7, %c0_8] : memref<8x10x16xf32, #tpu.memory_space<vmem>>, vector<8x10x16xf32>
    %cst = arith.constant dense<0.000000e+00> : vector<8x10x10xf32>
    %42 = tpu.matmul %41, %23, %cst {dimension_numbers = #tpu.dot_dimension_numbers<[2], [2], [1], [1], [0, 0, 0, 1, 1, 1], [0], [0]>} : vector<8x10x16xf32>, vector<8x10x16xf32>, vector<8x10x10xf32> -> vector<8x10x10xf32>
    %c0_9 = arith.constant 0 : index
    %c0_10 = arith.constant 0 : index
    %c0_11 = arith.constant 0 : index
    %43 = vector.load %arg9[%c0_9, %c0_10, %c0_11] : memref<8x10x1xf32, #tpu.memory_space<vmem>>, vector<8x10x1xf32>
    %cst_12 = arith.constant dense<0xFF800000> : vector<8x10xf32>
    %44 = vector.multi_reduction <maximumf>, %42, %cst_12 [2] : vector<8x10x10xf32> to vector<8x10xf32>
    %45 = vector.shape_cast %44 : vector<8x10xf32> to vector<8x10x1xf32>
    %46 = arith.maximumf %43, %45 : vector<8x10x1xf32>
    %47 = arith.subf %43, %46 : vector<8x10x1xf32>
    %48 = math.exp %47 : vector<8x10x1xf32>
    %49 = vector.broadcast %46 : vector<8x10x1xf32> to vector<8x10x10xf32>
    %50 = arith.subf %42, %49 : vector<8x10x10xf32>
    %51 = math.exp %50 : vector<8x10x10xf32>
    %c0_13 = arith.constant 0 : index
    %c0_14 = arith.constant 0 : index
    %c0_15 = arith.constant 0 : index
    %52 = vector.load %arg10[%c0_13, %c0_14, %c0_15] : memref<8x10x1xf32, #tpu.memory_space<vmem>>, vector<8x10x1xf32>
    %53 = arith.mulf %48, %52 : vector<8x10x1xf32>
    %cst_16 = arith.constant dense<0.000000e+00> : vector<8x10xf32>
    %54 = vector.multi_reduction <add>, %51, %cst_16 [2] : vector<8x10x10xf32> to vector<8x10xf32>
    %55 = vector.shape_cast %54 : vector<8x10xf32> to vector<8x10x1xf32>
    %56 = arith.addf %53, %55 : vector<8x10x1xf32>
    %c0_17 = arith.constant 0 : index
    %c0_18 = arith.constant 0 : index
    %c0_19 = arith.constant 0 : index
    %57 = vector.load %arg10[%c0_17, %c0_18, %c0_19] : memref<8x10x1xf32, #tpu.memory_space<vmem>>, vector<8x10x1xf32>
    tpu.vector_store %arg10[%c0_17, %c0_18, %c0_19], %56 {strides = array<i32>} : memref<8x10x1xf32, #tpu.memory_space<vmem>>, vector<8x10x1xf32>,
    %cst_20 = arith.constant dense<0.000000e+00> : vector<8x10x16xf32>
    %58 = tpu.matmul %51, %40, %cst_20 {dimension_numbers = #tpu.dot_dimension_numbers<[2], [1], [1], [2], [0, 0, 0, 1, 1, 2], [0], [0]>} : vector<8x10x10xf32>, vector<8x10x16xf32>, vector<8x10x16xf32> -> vector<8x10x16xf32>
    %c0_21 = arith.constant 0 : index
    %c0_22 = arith.constant 0 : index
    %c0_23 = arith.constant 0 : index
    %59 = vector.load %arg11[%c0_21, %c0_22, %c0_23] : memref<8x10x16xf32, #tpu.memory_space<vmem>>, vector<8x10x16xf32>
    %60 = vector.broadcast %48 : vector<8x10x1xf32> to vector<8x10x16xf32>
    %61 = arith.mulf %60, %59 : vector<8x10x16xf32>
    %62 = arith.addf %61, %58 : vector<8x10x16xf32>
    %c0_24 = arith.constant 0 : index
    %c0_25 = arith.constant 0 : index
    %c0_26 = arith.constant 0 : index
    %63 = vector.load %arg11[%c0_24, %c0_25, %c0_26] : memref<8x10x16xf32, #tpu.memory_space<vmem>>, vector<8x10x16xf32>
    tpu.vector_store %arg11[%c0_24, %c0_25, %c0_26], %62 {strides = array<i32>} : memref<8x10x16xf32, #tpu.memory_space<vmem>>, vector<8x10x16xf32>,
    %c0_27 = arith.constant 0 : index
    %c0_28 = arith.constant 0 : index
    %c0_29 = arith.constant 0 : index
    %64 = vector.load %arg9[%c0_27, %c0_28, %c0_29] : memref<8x10x1xf32, #tpu.memory_space<vmem>>, vector<8x10x1xf32>
    tpu.vector_store %arg9[%c0_27, %c0_28, %c0_29], %46 {strides = array<i32>} : memref<8x10x1xf32, #tpu.memory_space<vmem>>, vector<8x10x1xf32>,
    %c0_i32_30 = arith.constant 0 : i32
    %65 = arith.cmpi eq, %arg3, %c0_i32_30 : i32
    %66 = arith.extui %65 : i1 to i32
    %c0_i32_31 = arith.constant 0 : i32
    %67 = arith.cmpi ne, %66, %c0_i32_31 : i32
    scf.if %67 {
      %c0_32 = arith.constant 0 : index
      %c0_33 = arith.constant 0 : index
      %c0_34 = arith.constant 0 : index
      %68 = vector.load %arg10[%c0_32, %c0_33, %c0_34] : memref<8x10x1xf32, #tpu.memory_space<vmem>>, vector<8x10x1xf32>
      %69 = tpu.reciprocal %68 : vector<8x10x1xf32> -> vector<8x10x1xf32>
      %c0_35 = arith.constant 0 : index
      %c0_36 = arith.constant 0 : index
      %c0_37 = arith.constant 0 : index
      %70 = vector.load %arg11[%c0_35, %c0_36, %c0_37] : memref<8x10x16xf32, #tpu.memory_space<vmem>>, vector<8x10x16xf32>
      %71 = vector.broadcast %69 : vector<8x10x1xf32> to vector<8x10x16xf32>
      %72 = arith.mulf %70, %71 : vector<8x10x16xf32>
      %73 = vector.extract_strided_slice %72 {offsets = [0, 0, 0], sizes = [1, 10, 16], strides = [1, 1, 1]} : vector<8x10x16xf32> to vector<1x10x16xf32>
      %74 = vector.shape_cast %73 : vector<1x10x16xf32> to vector<10x16xf32>
      %75 = vector.extract_strided_slice %72 {offsets = [1, 0, 0], sizes = [1, 10, 16], strides = [1, 1, 1]} : vector<8x10x16xf32> to vector<1x10x16xf32>
      %76 = vector.shape_cast %75 : vector<1x10x16xf32> to vector<10x16xf32>
      %77 = vector.extract_strided_slice %72 {offsets = [2, 0, 0], sizes = [1, 10, 16], strides = [1, 1, 1]} : vector<8x10x16xf32> to vector<1x10x16xf32>
      %78 = vector.shape_cast %77 : vector<1x10x16xf32> to vector<10x16xf32>
      %79 = vector.extract_strided_slice %72 {offsets = [3, 0, 0], sizes = [1, 10, 16], strides = [1, 1, 1]} : vector<8x10x16xf32> to vector<1x10x16xf32>
      %80 = vector.shape_cast %79 : vector<1x10x16xf32> to vector<10x16xf32>
      %81 = vector.extract_strided_slice %72 {offsets = [4, 0, 0], sizes = [1, 10, 16], strides = [1, 1, 1]} : vector<8x10x16xf32> to vector<1x10x16xf32>
      %82 = vector.shape_cast %81 : vector<1x10x16xf32> to vector<10x16xf32>
      %83 = vector.extract_strided_slice %72 {offsets = [5, 0, 0], sizes = [1, 10, 16], strides = [1, 1, 1]} : vector<8x10x16xf32> to vector<1x10x16xf32>
      %84 = vector.shape_cast %83 : vector<1x10x16xf32> to vector<10x16xf32>
      %85 = vector.extract_strided_slice %72 {offsets = [6, 0, 0], sizes = [1, 10, 16], strides = [1, 1, 1]} : vector<8x10x16xf32> to vector<1x10x16xf32>
      %86 = vector.shape_cast %85 : vector<1x10x16xf32> to vector<10x16xf32>
      %87 = vector.extract_strided_slice %72 {offsets = [7, 0, 0], sizes = [1, 10, 16], strides = [1, 1, 1]} : vector<8x10x16xf32> to vector<1x10x16xf32>
      %88 = vector.shape_cast %87 : vector<1x10x16xf32> to vector<10x16xf32>
      %89 = tpu.concatenate %74, %76, %78, %80, %82, %84, %86, %88 in 1 : vector<10x16xf32>, vector<10x16xf32>, vector<10x16xf32>, vector<10x16xf32>, vector<10x16xf32>, vector<10x16xf32>, vector<10x16xf32>, vector<10x16xf32> -> vector<10x128xf32>
      %c0_38 = arith.constant 0 : index
      %c0_39 = arith.constant 0 : index
      %c0_40 = arith.constant 0 : index
      %90 = vector.load %arg7[%c0_38, %c0_39, %c0_40] : memref<1x10x128xf32, #tpu.memory_space<vmem>>, vector<1x10x128xf32>
      %91 = vector.shape_cast %90 : vector<1x10x128xf32> to vector<10x128xf32>
      %92 = vector.shape_cast %89 : vector<10x128xf32> to vector<1x10x128xf32>
      tpu.vector_store %arg7[%c0_38, %c0_39, %c0_40], %92 {strides = array<i32>} : memref<1x10x128xf32, #tpu.memory_space<vmem>>, vector<1x10x128xf32>,
    } else {
    }
    return
  }
  func.func @transform_0(%arg0: i32, %arg1: i32, %arg2: i32, %arg3: i32) -> (i32, i32, i32) {
    %c0_i32 = arith.constant 0 : i32
    return %arg0, %arg2, %arg1 : i32, i32, i32
  }
  func.func @transform_1(%arg0: i32, %arg1: i32, %arg2: i32, %arg3: i32) -> (i32, i32, i32) {
    %c0_i32 = arith.constant 0 : i32
    return %arg0, %arg3, %arg1 : i32, i32, i32
  }
  func.func @transform_2(%arg0: i32, %arg1: i32, %arg2: i32, %arg3: i32) -> (i32, i32, i32) {
    %c0_i32 = arith.constant 0 : i32
    return %arg0, %arg3, %arg1 : i32, i32, i32
  }
  func.func @transform_3(%arg0: i32, %arg1: i32, %arg2: i32, %arg3: i32) -> (i32, i32, i32) {
    %c0_i32 = arith.constant 0 : i32
    return %arg0, %arg2, %arg1 : i32, i32, i32
  }
}

</mosaic_0001>

<bundles_post_ra>
// kernel: tpu_custom_call.1
= control target key start
LH: loop header
LB: loop body
LE: loop exit
PB: predicated region body
PF: predicated region fallthrough
CT: control target
= control target key end

     0   :  { %s3401_s12 = smov 0   ;;  %s3403_s13 = smov 0   ;;  %s4091_s0 = inlined_call_operand.vmem [shape: f32[2,10,128], index: 0, kind: input, shape index: {}]   ;;  %s4092_s1 = inlined_call_operand.vmem [shape: f32[2,10,128], index: 1, kind: input, shape index: {}]   ;;  %s4093_s2 = inlined_call_operand.vmem [shape: f32[2,10,128], index: 2, kind: input, shape index: {}]   ;;  %s4094_s3 = inlined_call_operand.vmem [shape: f32[2,10,128], index: 3, kind: output, shape index: {}]  }
   0x1   :  { %s3405_s14 = smov 0  }
   0x2 LB: > { %s39_s15 = sadd.s32 1, %s3364_s13  ;;  %p2800_p0 = scmp.ge.s32.totalorder %s3368_s14, 1  ;;  %s3368_s14 = sphi %s3405_s14, %s13_s14   ;;  %s3364_s13 = sphi %s3403_s13, %s4115_s13   ;;  %s3360_s12 = sphi %s3401_s12, %s4114_s12  }
   0x3   : > { %p41_p1 = scmp.ge.s32.totalorder %s39_s15, 2  ;;  %p223_p2 = scmp.lt.s32.totalorder %s3368_s14, 3 }
   0x5   : > { %s4117_s15 = smov (%p41_p1, %s39_s15), 0  ;;  %p224_p3 = pnand %p2800_p0, %p223_p2 }
   0x6   : > { %p286_p4 = scmp.lt.s32.totalorder (!%p224_p3), %s3360_s12, 1  ;;  %vm375_vm0 = vcmask (!%p224_p3), 130048   ;;  %vm377_vm2 = vcmask (!%p224_p3), 123904   ;;  %s3370_s23 = smov (!%p224_p3), 112   ;;  %vm1245_vm3 = vcmask (!%p224_p3), 74752   ;;  %vm1241_vm4 = vcmask (!%p224_p3), 80896  }
   0x7   : > { %227 = sbr.rel (%p224_p3) target bundleno = 1104 (0x450), region = 32  ;;  %vm3431_vm1 = vmpackc.low (!%p224_p3), %vm375_vm0, %vm375_vm0  ;;  %s3371_s24 = smov (!%p224_p3), 96   ;;  %vm343_vm5 = vcmask (!%p224_p3), 1024   ;;  %vm341_vm6 = vcmask (!%p224_p3), 7168   ;;  %vm1603_vm7 = vcmask (!%p224_p3), 1041408   ;;  %vm3380_vm8 = vmmov (!%p224_p3), 1  }
   0x8   : > { %s3372_s25 = smov (!%p224_p3), 80   ;;  %s3373_s26 = smov (!%p224_p3), 64   ;;  %vm3656_vm9 = vmpackc.low (!%p224_p3), %vm1603_vm7, %vm3380_vm8  ;;  %vm2628_vm10 = vcmask (!%p224_p3), 261120   ;;  %vm2631_vm11 = vcmask (!%p224_p3), 392192   ;;  %vm2634_vm12 = vcmask (!%p224_p3), 523264   ;;  %vm2637_vm13 = vcmask (!%p224_p3), 654336  }
   0x9   : > { %s3374_s27 = smov (!%p224_p3), 48   ;;  %s3375_s28 = smov (!%p224_p3), 32   ;;  %vm2640_vm14 = vcmask (!%p224_p3), 785408   ;;  %vm2643_vm15 = vcmask (!%p224_p3), 916480  }
   0xa   : > { %s3376_s29 = smov (!%p224_p3), 16  }
   0xe   : > { %s4119_s12 = smov (!%p286_p4, %s3360_s12), 1 }
   0xf   : > { %s3419_s16 = sshll.u32 %s4119_s12, 4 }
  0x10   : > { %s309_s19 = scalar_lea.vmem %s4092_s1, %s3419_s16  ;;  %s296_s22 = scalar_lea.vmem %s4091_s0, %s3419_s16 }
  0x11   : > { %v457_v0 = vld [vmem:[%s309_s19] sm:$0xff]  ;;  %v458_v1 = vld [vmem:[%s309_s19 + $0x8] sm:$0x3]  ;;  %s322_s5 = scalar_lea.vmem %s4093_s2, %s3419_s16  ;;  %s335_s8 = scalar_lea.vmem %s4094_s3, %s3419_s16 }
  0x12   : > { %v393_v2 = vld [vmem:[%s296_s22] sm:$0xff]  ;;  %v3178_v3 = vpack.i.bf16 %v458_v1, %v457_v0  ;;  %v394_v4 = vld [vmem:[%s296_s22 + $0x8] sm:$0x3]  ;;  %v3047_v8 = vpack.c.bf16 %v458_v1, %v457_v0 }
  0x13   : > { %v395_v5 = vmul.f32 0.25, %v393_v2  ;;  %v396_v7 = vmul.f32 0.25, %v394_v4 }
  0x14   : > { %3179 = vrot.lane.b32.xlu0 %v3178_v3, %s3370_s23  ;;  %3184 = vrot.lane.b32.xlu1 %v3178_v3, %s3371_s24 }
  0x15   : > { %441 = vst.msk [vmem:[#allocation2] sm:$0xff] %vm375_vm0, %v395_v5  ;;  %3049 = vmatprep.subr.msk.bf16.mxu0 %vm3431_vm1, %v3047_v8 }
  0x16   : > { %442 = vst.msk [vmem:[#allocation2 + $0x8] sm:$0x3] %vm377_vm2, %v396_v7  ;;  %3052 = vmatpush3.bf16.xpose.msk.msra.mxu0 %vm3431_vm1, %v3047_v8  ;;  %v3378_v8 = vmov 0  }
  0x17   : > { %3213 = vset.pattern.permute.xlu1 %v3378_v8  ;;  %3214 = vset.pattern.permute.xlu0 %v3378_v8 }
  0x18   : > { %3189 = vrot.lane.b32.xlu0 %v3178_v3, %s3372_s25  ;;  %401 = vrot.lane.b32.xlu1 %v396_v7, %s3370_s23 }
  0x1c   : > { %v528_v9 = vld [vmem:[#allocation2] sm:$0xff]  ;;  %399 = vrot.lane.b32.xlu0 %v395_v5, %s3370_s23  ;;  %405 = vrot.lane.b32.xlu1 %v395_v5, %s3371_s24 }
  0x1d   : > { %v529_v10 = vld [vmem:[#allocation2 + $0x8] sm:$0x3]  ;;  %2939 = vmatprep.mubr.msk.f32.mxu0 %vm375_vm0, %v528_v9 }
  0x1e   : > { %2940 = vmatmul.mubr.msk.f32.vlgmr.msra.gmra.mrb[0].mxu0 %vm375_vm0, %v529_v10 }
  0x20   : > { %407 = vrot.lane.b32.xlu0 %v396_v7, %s3371_s24  ;;  %411 = vrot.lane.b32.xlu1 %v395_v5, %s3372_s25 }
  0x24   : > { %413 = vrot.lane.b32.xlu0 %v396_v7, %s3372_s25  ;;  %3194 = vrot.lane.b32.xlu1 %v3178_v3, %s3373_s26 }
  0x28   : > { %3199 = vrot.lane.b32.xlu0 %v3178_v3, %s3374_s27  ;;  %417 = vrot.lane.b32.xlu1 %v395_v5, %s3373_s26 }
  0x2c   : > { %419 = vrot.lane.b32.xlu0 %v396_v7, %s3373_s26  ;;  %423 = vrot.lane.b32.xlu1 %v395_v5, %s3374_s27 }
  0x30   : > { %425 = vrot.lane.b32.xlu0 %v396_v7, %s3374_s27  ;;  %3204 = vrot.lane.b32.xlu1 %v3178_v3, %s3375_s28 }
  0x34   : > { %429 = vrot.lane.b32.xlu0 %v395_v5, %s3375_s28  ;;  %3209 = vrot.lane.b32.xlu1 %v3178_v3, %s3376_s29 }
  0x38   : > { %431 = vrot.lane.b32.xlu0 %v396_v7, %s3375_s28  ;;  %435 = vrot.lane.b32.xlu1 %v395_v5, %s3376_s29 }
  0x3c   : > { %437 = vrot.lane.b32.xlu0 %v396_v7, %s3376_s29  ;;  %v3377_v7 = vmov -inf  }
  0x3d   : > { %344 = vst.msk [vmem:[#allocation3 + $0x8] sm:$0x3] %vm343_vm5, %v3377_v7  ;;  %346 = vst.msk [vmem:[#allocation3 + $0x18] sm:$0x3] %vm343_vm5, %v3377_v7 }
  0x3e   : > { %348 = vst.msk [vmem:[#allocation3 + $0x28] sm:$0x3] %vm343_vm5, %v3377_v7  ;;  %350 = vst.msk [vmem:[#allocation3 + $0x38] sm:$0x3] %vm343_vm5, %v3377_v7 }
  0x3f   : > { %352 = vst.msk [vmem:[#allocation3 + $0x48] sm:$0x3] %vm343_vm5, %v3377_v7  ;;  %354 = vst.msk [vmem:[#allocation3 + $0x58] sm:$0x3] %vm343_vm5, %v3377_v7 }
  0x40   : > { %356 = vst.msk [vmem:[#allocation3 + $0x68] sm:$0x3] %vm343_vm5, %v3377_v7  ;;  %358 = vst.msk [vmem:[#allocation3 + $0x78] sm:$0x3] %vm343_vm5, %v3377_v7 }
  0x41   : > { %342 = vst.msk [vmem:[#allocation3] sm:$0xff] %vm341_vm6, %v3377_v7  ;;  %345 = vst.msk [vmem:[#allocation3 + $0x10] sm:$0xff] %vm341_vm6, %v3377_v7 }
  0x42   : > { %347 = vst.msk [vmem:[#allocation3 + $0x20] sm:$0xff] %vm341_vm6, %v3377_v7  ;;  %349 = vst.msk [vmem:[#allocation3 + $0x30] sm:$0xff] %vm341_vm6, %v3377_v7 }
  0x43   : > { %351 = vst.msk [vmem:[#allocation3 + $0x40] sm:$0xff] %vm341_vm6, %v3377_v7  ;;  %353 = vst.msk [vmem:[#allocation3 + $0x50] sm:$0xff] %vm341_vm6, %v3377_v7 }
  0x44   : > { %355 = vst.msk [vmem:[#allocation3 + $0x60] sm:$0xff] %vm341_vm6, %v3377_v7  ;;  %357 = vst.msk [vmem:[#allocation3 + $0x70] sm:$0xff] %vm341_vm6, %v3377_v7 }
  0x86   : > { %v3180_v11 = vpop.permute.xlu0 %3179  ;;  %v3185_v12 = vpop.permute.xlu1 %3184 }
  0x87   : > { %v3187_v13 = vunpack.i.h.bf16 %v3185_v12  ;;  %v3186_v14 = vunpack.i.l.bf16 %v3185_v12  ;;  %v3182_v15 = vunpack.i.h.bf16 %v3180_v11  ;;  %v3181_v16 = vunpack.i.l.bf16 %v3180_v11 }
  0x89   : > { %v3059_v17 = vpack.c.bf16 %v3187_v13, %v3186_v14  ;;  %v3053_v18 = vpack.c.bf16 %v3182_v15, %v3181_v16 }
  0x8a   : > { %v3190_v19 = vpop.permute.xlu0 %3189  ;;  %v402_v20 = vpop.permute.xlu1 %401 }
  0x8b   : > { %v3192_v21 = vunpack.i.h.bf16 %v3190_v19  ;;  %v3191_v22 = vunpack.i.l.bf16 %v3190_v19  ;;  %3055 = vmatprep.subr.msk.bf16.mxu1 %vm3431_vm1, %v3053_v18  ;;  %444 = vst.msk [vmem:[#allocation2 + $0x18] sm:$0x3] %vm377_vm2, %v402_v20  ;;  %3061 = vmatprep.subr.msk.bf16.mxu0 %vm3431_vm1, %v3059_v17 }
  0x8c   : > { %3058 = vmatpush3.bf16.xpose.msk.msra.mxu1 %vm3431_vm1, %v3053_v18  ;;  %3064 = vmatpush3.bf16.xpose.msk.msra.mxu0 %vm3431_vm1, %v3059_v17 }
  0x8d   : > { %v3065_v23 = vpack.c.bf16 %v3192_v21, %v3191_v22 }
  0x8e   : > { %v400_v24 = vpop.permute.xlu0 %399  ;;  %v406_v25 = vpop.permute.xlu1 %405 }
  0x8f   : > { %443 = vst.msk [vmem:[#allocation2 + $0x10] sm:$0xff] %vm375_vm0, %v400_v24  ;;  %3067 = vmatprep.subr.msk.bf16.mxu1 %vm3431_vm1, %v3065_v23  ;;  %445 = vst.msk [vmem:[#allocation2 + $0x20] sm:$0xff] %vm375_vm0, %v406_v25 }
  0x92   : > { %v408_v26 = vpop.permute.xlu0 %407  ;;  %v412_v27 = vpop.permute.xlu1 %411  ;;  %v531_v28 = vld [vmem:[#allocation2 + $0x18] sm:$0x3] }
  0x93   : > { %446 = vst.msk [vmem:[#allocation2 + $0x28] sm:$0x3] %vm377_vm2, %v408_v26  ;;  %v3578_v26 = vld [vmem:[#allocation3 + $0x8] sm:$0x3] }
  0x94   : > { %447 = vst.msk [vmem:[#allocation2 + $0x30] sm:$0xff] %vm375_vm0, %v412_v27 }
  0x96   : > { %v414_v29 = vpop.permute.xlu0 %413  ;;  %v530_v30 = vld [vmem:[#allocation2 + $0x10] sm:$0xff]  ;;  %v3195_v31 = vpop.permute.xlu1 %3194  ;;  %v532_v32 = vld [vmem:[#allocation2 + $0x20] sm:$0xff] }
  0x97   : > { %448 = vst.msk [vmem:[#allocation2 + $0x38] sm:$0x3] %vm377_vm2, %v414_v29  ;;  %2946 = vmatprep.mubr.msk.f32.mxu1 %vm375_vm0, %v530_v30  ;;  %v3197_v33 = vunpack.i.h.bf16 %v3195_v31  ;;  %v3196_v34 = vunpack.i.l.bf16 %v3195_v31  ;;  %2953 = vmatprep.mubr.msk.f32.mxu0 %vm375_vm0, %v532_v32  ;;  %v3584_v29 = vld [vmem:[#allocation3] sm:$0xff] }
  0x98   : > { %2947 = vmatmul.mubr.msk.f32.vlgmr.msra.gmra.mrb[0].mxu1 %vm375_vm0, %v531_v28 }
  0x99   : > { %3070 = vmatpush3.bf16.xpose.msk.msra.mxu1 %vm3431_vm1, %v3065_v23  ;;  %v3071_v35 = vpack.c.bf16 %v3197_v33, %v3196_v34 }
  0x9a   : > { %v3200_v36 = vpop.permute.xlu0 %3199  ;;  %v533_v37 = vld [vmem:[#allocation2 + $0x28] sm:$0x3]  ;;  %v418_v38 = vpop.permute.xlu1 %417 }
  0x9b   : > { %v534_v39 = vld [vmem:[#allocation2 + $0x30] sm:$0xff]  ;;  %v3202_v40 = vunpack.i.h.bf16 %v3200_v36  ;;  %v3201_v41 = vunpack.i.l.bf16 %v3200_v36  ;;  %2954 = vmatmul.mubr.msk.f32.vlgmr.msra.gmra.mrb[2].mxu0 %vm375_vm0, %v533_v37  ;;  %449 = vst.msk [vmem:[#allocation2 + $0x40] sm:$0xff] %vm375_vm0, %v418_v38  ;;  %3073 = vmatprep.subr.msk.bf16.mxu0 %vm3431_vm1, %v3071_v35 }
  0x9c   : > { %3076 = vmatpush3.bf16.xpose.msk.msra.mxu0 %vm3431_vm1, %v3071_v35  ;;  %2960 = vmatprep.mubr.msk.f32.mxu1 %vm375_vm0, %v534_v39  ;;  %v3379_v35 = vmov 0.0  }
  0x9d   : > { %v3077_v42 = vpack.c.bf16 %v3202_v40, %v3201_v41  ;;  %362 = vst.msk [vmem:[#allocation4 + $0x18] sm:$0x3] %vm343_vm5, %v3379_v35  ;;  %360 = vst.msk [vmem:[#allocation4 + $0x8] sm:$0x3] %vm343_vm5, %v3379_v35 }
  0x9e   : > { %v420_v43 = vpop.permute.xlu0 %419  ;;  %v424_v44 = vpop.permute.xlu1 %423  ;;  %v535_v45 = vld [vmem:[#allocation2 + $0x38] sm:$0x3]  ;;  %359 = vst.msk [vmem:[#allocation4] sm:$0xff] %vm341_vm6, %v3379_v35  ;;  %361 = vst.msk [vmem:[#allocation4 + $0x10] sm:$0xff] %vm341_vm6, %v3379_v35 }
  0x9f   : > { %450 = vst.msk [vmem:[#allocation2 + $0x48] sm:$0x3] %vm377_vm2, %v420_v43  ;;  %3079 = vmatprep.subr.msk.bf16.mxu1 %vm3431_vm1, %v3077_v42  ;;  %378 = vst.msk [vmem:[#allocation5 + $0x8] sm:$0x3] %vm377_vm2, %v3379_v35 }
  0xa0   : > { %451 = vst.msk [vmem:[#allocation2 + $0x50] sm:$0xff] %vm375_vm0, %v424_v44  ;;  %2961 = vmatmul.mubr.msk.f32.vlgmr.msra.gmra.mrb[2].mxu1 %vm375_vm0, %v535_v45  ;;  %376 = vst.msk [vmem:[#allocation5] sm:$0xff] %vm375_vm0, %v3379_v35 }
  0xa1   : > { %3082 = vmatpush3.bf16.xpose.msk.msra.mxu1 %vm3431_vm1, %v3077_v42  ;;  %363 = vst.msk [vmem:[#allocation4 + $0x20] sm:$0xff] %vm341_vm6, %v3379_v35  ;;  %365 = vst.msk [vmem:[#allocation4 + $0x30] sm:$0xff] %vm341_vm6, %v3379_v35 }
  0xa2   : > { %v426_v46 = vpop.permute.xlu0 %425  ;;  %v3205_v47 = vpop.permute.xlu1 %3204  ;;  %v536_v48 = vld [vmem:[#allocation2 + $0x40] sm:$0xff]  ;;  %364 = vst.msk [vmem:[#allocation4 + $0x28] sm:$0x3] %vm343_vm5, %v3379_v35  ;;  %366 = vst.msk [vmem:[#allocation4 + $0x38] sm:$0x3] %vm343_vm5, %v3379_v35 }
  0xa3   : > { %452 = vst.msk [vmem:[#allocation2 + $0x58] sm:$0x3] %vm377_vm2, %v426_v46  ;;  %v3207_v49 = vunpack.i.h.bf16 %v3205_v47  ;;  %v3206_v50 = vunpack.i.l.bf16 %v3205_v47  ;;  %2967 = vmatprep.mubr.msk.f32.mxu0 %vm375_vm0, %v536_v48  ;;  %380 = vst.msk [vmem:[#allocation5 + $0x18] sm:$0x3] %vm377_vm2, %v3379_v35  ;;  %v459_v46 = vld [vmem:[%s322_s5] sm:$0xff] }
  0xa4   : > { %367 = vst.msk [vmem:[#allocation4 + $0x40] sm:$0xff] %vm341_vm6, %v3379_v35  ;;  %369 = vst.msk [vmem:[#allocation4 + $0x50] sm:$0xff] %vm341_vm6, %v3379_v35  ;;  %v460_v47 = vld [vmem:[%s322_s5 + $0x8] sm:$0x3] }
  0xa5   : > { %v3083_v51 = vpack.c.bf16 %v3207_v49, %v3206_v50  ;;  %368 = vst.msk [vmem:[#allocation4 + $0x48] sm:$0x3] %vm343_vm5, %v3379_v35  ;;  %370 = vst.msk [vmem:[#allocation4 + $0x58] sm:$0x3] %vm343_vm5, %v3379_v35  ;;  %v3660_v49 = vpack.i.bf16 %v460_v47, %v459_v46  ;;  %v3095_v50 = vpack.c.bf16 %v460_v47, %v459_v46 }
  0xa6   : > { %v430_v52 = vpop.permute.xlu0 %429  ;;  %v537_v53 = vld [vmem:[#allocation2 + $0x48] sm:$0x3]  ;;  %v3210_v54 = vpop.permute.xlu1 %3209  ;;  %371 = vst.msk [vmem:[#allocation4 + $0x60] sm:$0xff] %vm341_vm6, %v3379_v35  ;;  %373 = vst.msk [vmem:[#allocation4 + $0x70] sm:$0xff] %vm341_vm6, %v3379_v35 }
  0xa7   : > { %v538_v55 = vld [vmem:[#allocation2 + $0x50] sm:$0xff]  ;;  %453 = vst.msk [vmem:[#allocation2 + $0x60] sm:$0xff] %vm375_vm0, %v430_v52  ;;  %2968 = vmatmul.mubr.msk.f32.vlgmr.msra.gmra.mrb[4].mxu0 %vm375_vm0, %v537_v53  ;;  %v3212_v56 = vunpack.i.h.bf16 %v3210_v54  ;;  %v3211_v57 = vunpack.i.l.bf16 %v3210_v54  ;;  %3085 = vmatprep.subr.msk.bf16.mxu0 %vm3431_vm1, %v3083_v51  ;;  %379 = vst.msk [vmem:[#allocation5 + $0x10] sm:$0xff] %vm375_vm0, %v3379_v35 }
  0xa8   : > { %2974 = vmatprep.mubr.msk.f32.mxu1 %vm375_vm0, %v538_v55  ;;  %3088 = vmatpush3.bf16.xpose.msk.msra.mxu0 %vm3431_vm1, %v3083_v51  ;;  %372 = vst.msk [vmem:[#allocation4 + $0x68] sm:$0x3] %vm343_vm5, %v3379_v35  ;;  %374 = vst.msk [vmem:[#allocation4 + $0x78] sm:$0x3] %vm343_vm5, %v3379_v35  ;;  %v3666_v51 = vld [vmem:[#allocation3 + $0x18] sm:$0x3] }
  0xa9   : > { %v3089_v58 = vpack.c.bf16 %v3212_v56, %v3211_v57  ;;  %381 = vst.msk [vmem:[#allocation5 + $0x20] sm:$0xff] %vm375_vm0, %v3379_v35  ;;  %383 = vst.msk [vmem:[#allocation5 + $0x30] sm:$0xff] %vm375_vm0, %v3379_v35  ;;  %3097 = vmatprep.subr.msk.bf16.mxu0 %vm3656_vm9, %v3095_v50  ;;  %v3668_v52 = vld [vmem:[#allocation3 + $0x10] sm:$0xff]  ;;  %v3676_v57 = vld [vmem:[#allocation3 + $0x28] sm:$0x3] }
  0xaa   : > { %v432_v59 = vpop.permute.xlu0 %431  ;;  %v539_v60 = vld [vmem:[#allocation2 + $0x58] sm:$0x3]  ;;  %v436_v61 = vpop.permute.xlu1 %435  ;;  %382 = vst.msk [vmem:[#allocation5 + $0x28] sm:$0x3] %vm377_vm2, %v3379_v35  ;;  %384 = vst.msk [vmem:[#allocation5 + $0x38] sm:$0x3] %vm377_vm2, %v3379_v35 }
  0xab   : > { %454 = vst.msk [vmem:[#allocation2 + $0x68] sm:$0x3] %vm377_vm2, %v432_v59  ;;  %2975 = vmatmul.mubr.msk.f32.vlgmr.msra.gmra.mrb[4].mxu1 %vm375_vm0, %v539_v60  ;;  %3091 = vmatprep.subr.msk.bf16.mxu1 %vm3431_vm1, %v3089_v58  ;;  %386 = vst.msk [vmem:[#allocation5 + $0x48] sm:$0x3] %vm377_vm2, %v3379_v35  ;;  %v3683_v59 = vld [vmem:[#allocation3 + $0x20] sm:$0xff] }
  0xac   : > { %455 = vst.msk [vmem:[#allocation2 + $0x70] sm:$0xff] %vm375_vm0, %v436_v61  ;;  %3094 = vmatpush3.bf16.xpose.msk.msra.mxu1 %vm3431_vm1, %v3089_v58  ;;  %385 = vst.msk [vmem:[#allocation5 + $0x40] sm:$0xff] %vm375_vm0, %v3379_v35 }
  0xad   : > { %387 = vst.msk [vmem:[#allocation5 + $0x50] sm:$0xff] %vm375_vm0, %v3379_v35  ;;  %389 = vst.msk [vmem:[#allocation5 + $0x60] sm:$0xff] %vm375_vm0, %v3379_v35 }
  0xae   : > { %v438_v62 = vpop.permute.xlu0 %437  ;;  %v540_v63 = vld [vmem:[#allocation2 + $0x60] sm:$0xff]  ;;  %388 = vst.msk [vmem:[#allocation5 + $0x58] sm:$0x3] %vm377_vm2, %v3379_v35  ;;  %390 = vst.msk [vmem:[#allocation5 + $0x68] sm:$0x3] %vm377_vm2, %v3379_v35 }
  0xaf   : > { %456 = vst.msk [vmem:[#allocation2 + $0x78] sm:$0x3] %vm377_vm2, %v438_v62  ;;  %2981 = vmatprep.mubr.msk.f32.mxu0 %vm375_vm0, %v540_v63  ;;  %392 = vst.msk [vmem:[#allocation5 + $0x78] sm:$0x3] %vm377_vm2, %v3379_v35 }
  0xb0   : > { %391 = vst.msk [vmem:[#allocation5 + $0x70] sm:$0xff] %vm375_vm0, %v3379_v35  ;;  %v3741_v35 = vld [vmem:[#allocation3 + $0x50] sm:$0xff] }
  0xb2   : > { %v541_v0 = vld [vmem:[#allocation2 + $0x68] sm:$0x3] }
  0xb3   : > { %v542_v1 = vld [vmem:[#allocation2 + $0x70] sm:$0xff]  ;;  %2982 = vmatmul.mubr.msk.f32.vlgmr.msra.gmra.mrb[6].mxu0 %vm375_vm0, %v541_v0 }
  0xb4   : > { %2988 = vmatprep.mubr.msk.f32.mxu1 %vm375_vm0, %v542_v1  ;;  %3100 = vmatpush3.bf16.msk.msra.mxu0 %vm3656_vm9, %v3095_v50  ;;  %v3695_v1 = vld [vmem:[#allocation3 + $0x38] sm:$0x3] }
  0xb6   : > { %v543_v2 = vld [vmem:[#allocation2 + $0x78] sm:$0x3] }
  0xb7   : > { %2989 = vmatmul.mubr.msk.f32.vlgmr.msra.gmra.mrb[6].mxu1 %vm375_vm0, %v543_v2 }
  0xf1   : > { %v3520_v3 = vpop.f32.mrb[0].mxu0 }
  0xf2   : > { %v1246_v4 = vsel %vm1245_vm3, %v3520_v3, -inf  ;;  %v3524_v5 = vpop.f32.mrb[1].mxu0 }
  0xf3   : > { %1247 = vmax.xlane.f32.xlu0 %v1246_v4  ;;  %v1242_v6 = vsel %vm1241_vm4, %v3524_v5, -inf  ;;  %v3702_v4 = vld [vmem:[#allocation3 + $0x30] sm:$0xff] }
  0xf4   : > { %1243 = vmax.xlane.f32.xlu1 %v1242_v6 }
 0x16b   : > { %v3544_v9 = vpop.f32.mrb[0].mxu1 }
 0x16c   : > { %v3546_v10 = vpop.f32.mrb[1].mxu1  ;;  %v1252_v11 = vsel %vm1245_vm3, %v3544_v9, -inf }
 0x16d   : > { %1253 = vmax.xlane.f32.xlu1 %v1252_v11  ;;  %v1249_v12 = vsel %vm1241_vm4, %v3546_v10, -inf }
 0x16e   : > { %1250 = vmax.xlane.f32.xlu0 %v1249_v12  ;;  %v3552_v13 = vpop.f32.mrb[2].mxu0 }
 0x16f   : > { %v3554_v14 = vpop.f32.mrb[3].mxu0  ;;  %v1258_v15 = vsel %vm1245_vm3, %v3552_v13, -inf }
 0x170   : > { %v1255_v16 = vsel %vm1241_vm4, %v3554_v14, -inf }
 0x171   : > { %1259 = vmax.xlane.f32.xlu1 %v1258_v15 }
 0x172   : > { %1256 = vmax.xlane.f32.xlu0 %v1255_v16 }
 0x173   : > { %v3560_v17 = vpop.f32.mrb[2].mxu1 }
 0x174   : > { %v3562_v18 = vpop.f32.mrb[3].mxu1  ;;  %v1264_v19 = vsel %vm1245_vm3, %v3560_v17, -inf }
 0x175   : > { %1265 = vmax.xlane.f32.xlu1 %v1264_v19  ;;  %v1261_v20 = vsel %vm1241_vm4, %v3562_v18, -inf  ;;  %v3723_v19 = vld [vmem:[#allocation3 + $0x48] sm:$0x3] }
 0x176   : > { %1262 = vmax.xlane.f32.xlu0 %v1261_v20  ;;  %v3725_v20 = vld [vmem:[#allocation3 + $0x40] sm:$0xff] }
 0x17a   : > { %v3568_v21 = vpop.f32.mrb[4].mxu0 }
 0x17b   : > { %v1270_v22 = vsel %vm1245_vm3, %v3568_v21, -inf  ;;  %v3572_v23 = vpop.f32.mrb[5].mxu0 }
 0x17c   : > { %1271 = vmax.xlane.f32.xlu1 %v1270_v22  ;;  %v1267_v24 = vsel %vm1241_vm4, %v3572_v23, -inf }
 0x17d   : > { %1268 = vmax.xlane.f32.xlu0 %v1267_v24 }
 0x17e   : > { %v3576_v25 = vpop.f32.mrb[4].mxu1 }
 0x17f   : > { %v1276_v27 = vsel %vm1245_vm3, %v3576_v25, -inf  ;;  %v3582_v28 = vpop.f32.mrb[5].mxu1 }
 0x180   : > { %1277 = vmax.xlane.f32.xlu1 %v1276_v27  ;;  %v1273_v30 = vsel %vm1241_vm4, %v3582_v28, -inf  ;;  %v1248_v31 = vpop.xlane.xlu0 %1247 }
 0x181   : > { %1274 = vmax.xlane.f32.xlu0 %v1273_v30  ;;  %v3589_v32 = vmax.f32 %v3578_v26, %v1248_v31  ;;  %v1244_v33 = vpop.xlane.xlu1 %1243  ;;  %v3731_v30 = vld [vmem:[#allocation3 + $0x58] sm:$0x3] }
 0x182   : > { %v3592_v34 = vmax.f32 %v3584_v29, %v1244_v33 }
 0x183   : > { %2408 = vst.msk [vmem:[#allocation3 + $0x8] sm:$0x3] %vm343_vm5, %v3589_v32 }
 0x184   : > { %v1307_v37 = vsub.f32 %v3584_v29, %v3592_v34  ;;  %2407 = vst.msk [vmem:[#allocation3] sm:$0xff] %vm341_vm6, %v3592_v34 }
 0x186   : > { %v3634_v38 = vpop.f32.mrb[6].mxu0 }
 0x187   : > { %v3636_v39 = vpop.f32.mrb[7].mxu0  ;;  %v1282_v40 = vsel %vm1245_vm3, %v3634_v38, -inf }
 0x188   : > { %1283 = vmax.xlane.f32.xlu1 %v1282_v40  ;;  %v1279_v41 = vsel %vm1241_vm4, %v3636_v39, -inf }
 0x189   : > { %1280 = vmax.xlane.f32.xlu0 %v1279_v41 }
 0x18a   : > { %v3642_v42 = vpop.f32.mrb[6].mxu1 }
 0x18b   : > { %v3644_v43 = vpop.f32.mrb[7].mxu1  ;;  %v1288_v44 = vsel %vm1245_vm3, %v3642_v42, -inf }
 0x18c   : > { %1289 = vmax.xlane.f32.xlu1 %v1288_v44  ;;  %v1285_v45 = vsel %vm1241_vm4, %v3644_v43, -inf }
 0x18d   : > { %1286 = vmax.xlane.f32.xlu0 %v1285_v45 }
 0x19d   : > { %1362 = vperm.xlu1 %3213, %v3589_v32  }
 0x1a3   : > { %1357 = vperm.xlu0 %3214, %v3592_v34  }
 0x1fa   : > { %v1254_v53 = vpop.xlane.xlu1 %1253 }
 0x1fb   : > { %v3671_v54 = vmax.f32 %v3666_v51, %v1254_v53  ;;  %v1251_v55 = vpop.xlane.xlu0 %1250  ;;  %v3764_v53 = vld [vmem:[#allocation3 + $0x68] sm:$0x3] }
 0x1fc   : > { %v3674_v56 = vmax.f32 %v3668_v52, %v1251_v55  ;;  %v3766_v55 = vld [vmem:[#allocation3 + $0x60] sm:$0xff] }
 0x1fd   : > { %2410 = vst.msk [vmem:[#allocation3 + $0x18] sm:$0x3] %vm343_vm5, %v3671_v54  ;;  %1372 = vperm.xlu1 %3213, %v3671_v54  }
 0x1fe   : > { %2409 = vst.msk [vmem:[#allocation3 + $0x10] sm:$0xff] %vm341_vm6, %v3674_v56  ;;  %v1260_v61 = vpop.xlane.xlu1 %1259 }
 0x1ff   : > { %v3690_v62 = vmax.f32 %v3676_v57, %v1260_v61  ;;  %v1257_v63 = vpop.xlane.xlu0 %1256 }
 0x200   : > { %v3693_v0 = vmax.f32 %v3683_v59, %v1257_v63 }
 0x201   : > { %2412 = vst.msk [vmem:[#allocation3 + $0x28] sm:$0x3] %vm343_vm5, %v3690_v62  ;;  %1382 = vperm.xlu1 %3213, %v3690_v62  }
 0x202   : > { %2411 = vst.msk [vmem:[#allocation3 + $0x20] sm:$0xff] %vm341_vm6, %v3693_v0  ;;  %v1266_v7 = vpop.xlane.xlu1 %1265  ;;  %v4101_v29 = vsub.f32 %v3683_v59, %v3693_v0 }
 0x203   : > { %v3709_v8 = vmax.f32 %v3695_v1, %v1266_v7  ;;  %v1263_v11 = vpop.xlane.xlu0 %1262 }
 0x204   : > { %v3712_v12 = vmax.f32 %v3702_v4, %v1263_v11  ;;  %v3772_v11 = vld [vmem:[#allocation3 + $0x78] sm:$0x3]  ;;  %v1331_v34 = vmul.f32 1.442695, %v4101_v29 }
 0x205   : > { %2414 = vst.msk [vmem:[#allocation3 + $0x38] sm:$0x3] %vm343_vm5, %v3709_v8  ;;  %1367 = vperm.xlu1 %3213, %v3674_v56  }
 0x206   : > { %2413 = vst.msk [vmem:[#allocation3 + $0x30] sm:$0xff] %vm341_vm6, %v3712_v12 }
 0x209   : > { %v1272_v22 = vpop.xlane.xlu1 %1271  ;;  %1377 = vperm.xlu1 %3213, %v3693_v0  }
 0x20a   : > { %v3729_v24 = vmax.f32 %v3723_v19, %v1272_v22  ;;  %v1269_v27 = vpop.xlane.xlu0 %1268 }
 0x20b   : > { %v3734_v31 = vmax.f32 %v3725_v20, %v1269_v27 }
 0x20c   : > { %2416 = vst.msk [vmem:[#allocation3 + $0x48] sm:$0x3] %vm343_vm5, %v3729_v24  ;;  %1402 = vperm.xlu0 %3214, %v3729_v24  }
 0x20d   : > { %v1278_v40 = vpop.xlane.xlu1 %1277  ;;  %2415 = vst.msk [vmem:[#allocation3 + $0x40] sm:$0xff] %vm341_vm6, %v3734_v31  ;;  %1392 = vperm.xlu1 %3213, %v3709_v8   ;;  %v4105_v59 = vsub.f32 %v3725_v20, %v3734_v31 }
 0x20e   : > { %v3749_v44 = vmax.f32 %v3731_v30, %v1278_v40  ;;  %v1275_v45 = vpop.xlane.xlu0 %1274  ;;  %v3782_v40 = vld [vmem:[#allocation3 + $0x70] sm:$0xff] }
 0x20f   : > { %v3752_v46 = vmax.f32 %v3741_v35, %v1275_v45  ;;  %v1339_v0 = vmul.f32 1.442695, %v4105_v59 }
 0x210   : > { %2418 = vst.msk [vmem:[#allocation3 + $0x58] sm:$0x3] %vm343_vm5, %v3749_v44  ;;  %1412 = vperm.xlu0 %3214, %v3749_v44  }
 0x211   : > { %2417 = vst.msk [vmem:[#allocation3 + $0x50] sm:$0xff] %vm341_vm6, %v3752_v46  ;;  %1387 = vperm.xlu1 %3213, %v3712_v12  }
 0x215   : > { %1397 = vperm.xlu1 %3213, %v3734_v31   ;;  %v1284_v61 = vpop.xlane.xlu1 %1283  ;;  %v4108_v31 = vsub.f32 %v3723_v19, %v3729_v24 }
 0x216   : > { %v3770_v63 = vmax.f32 %v3764_v53, %v1284_v61  ;;  %v1281_v7 = vpop.xlane.xlu0 %1280 }
 0x217   : > { %v3775_v22 = vmax.f32 %v3766_v55, %v1281_v7 }
 0x218   : > { %2420 = vst.msk [vmem:[#allocation3 + $0x68] sm:$0x3] %vm343_vm5, %v3770_v63  ;;  %1422 = vperm.xlu0 %3214, %v3770_v63  }
 0x219   : > { %1407 = vperm.xlu1 %3213, %v3752_v46   ;;  %v1290_v45 = vpop.xlane.xlu1 %1289  ;;  %2419 = vst.msk [vmem:[#allocation3 + $0x60] sm:$0xff] %vm341_vm6, %v3775_v22 }
 0x21a   : > { %v3790_v7 = vmax.f32 %v3772_v11, %v1290_v45  ;;  %v1287_v27 = vpop.xlane.xlu0 %1286 }
 0x21b   : > { %v3793_v47 = vmax.f32 %v3782_v40, %v1287_v27 }
 0x21c   : > { %2422 = vst.msk [vmem:[#allocation3 + $0x78] sm:$0x3] %vm343_vm5, %v3790_v7  ;;  %1432 = vperm.xlu0 %3214, %v3790_v7  }
 0x21d   : > { %v1363_v50 = vpop.permute.xlu1 %1362  ;;  %1417 = vperm.xlu1 %3213, %v3775_v22   ;;  %2421 = vst.msk [vmem:[#allocation3 + $0x70] sm:$0xff] %vm341_vm6, %v3793_v47  ;;  %v4111_v19 = vsub.f32 %v3782_v40, %v3793_v47 }
 0x21e   : > { %v1436_v27 = vsub.f32 %v3520_v3, %v1363_v50 }
 0x21f   : > { %v1351_v24 = vmul.f32 1.442695, %v4111_v19 }
 0x220   : > { %3221 = vrot.lane.b32.xlu0 %v3660_v49, %s3371_s24  ;;  %v1453_v15 = vmul.f32 1.442695, %v1436_v27 }
 0x221   : > { %1427 = vperm.xlu1 %3213, %v3793_v47   ;;  %v4113_v47 = vsub.f32 %v3772_v11, %v3790_v7 }
 0x222   : > { %v1358_v45 = vpop.permute.xlu0 %1357 }
 0x223   : > { %v1435_v33 = vsub.f32 %v3524_v5, %v1358_v45  ;;  %v1353_v40 = vmul.f32 1.442695, %v4113_v47 }
 0x224   : > { %3231 = vrot.lane.b32.xlu0 %v3660_v49, %s3373_s26 }
 0x225   : > { %v1451_v41 = vmul.f32 1.442695, %v1435_v33  ;;  %3216 = vrot.lane.b32.xlu1 %v3660_v49, %s3370_s23 }
 0x227   : > { %3250 = vpow2.f32 %v1451_v41 }
 0x228   : > { %3252 = vpow2.f32 %v1453_v15  ;;  %3241 = vrot.lane.b32.xlu0 %v3660_v49, %s3375_s28 }
 0x229   : > { %3226 = vrot.lane.b32.xlu1 %v3660_v49, %s3372_s25 }
 0x22d   : > { %3236 = vrot.lane.b32.xlu1 %v3660_v49, %s3374_s27 }
 0x231   : > { %v3820_v3 = vpop.eup %3250  ;;  %3246 = vrot.lane.b32.xlu1 %v3660_v49, %s3376_s29 }
 0x232   : > { %v3824_v5 = vpop.eup %3252  ;;  %2995 = vmatprep.mubr.msk.f32.mxu0 %vm1241_vm4, %v3820_v3 }
 0x233   : > { %2996 = vmatmul.mubr.msk.f32.vlgmr.msra.gmra.mrb[8].mxu0 %vm1241_vm4, %v3824_v5 }
 0x27c   : > { %v1373_v15 = vpop.permute.xlu1 %1372 }
 0x27d   : > { %v1438_v33 = vsub.f32 %v3544_v9, %v1373_v15 }
 0x27f   : > { %v1457_v41 = vmul.f32 1.442695, %v1438_v33 }
 0x280   : > { %v1383_v50 = vpop.permute.xlu1 %1382 }
 0x281   : > { %3254 = vpow2.f32 %v1457_v41  ;;  %v1440_v27 = vsub.f32 %v3552_v13, %v1383_v50 }
 0x283   : > { %v1461_v45 = vmul.f32 1.442695, %v1440_v27 }
 0x284   : > { %v1368_v61 = vpop.permute.xlu1 %1367 }
 0x285   : > { %3256 = vpow2.f32 %v1461_v45  ;;  %v1437_v49 = vsub.f32 %v3546_v10, %v1368_v61 }
 0x287   : > { %v1455_v2 = vmul.f32 1.442695, %v1437_v49 }
 0x288   : > { %v1378_v16 = vpop.permute.xlu1 %1377 }
 0x289   : > { %3258 = vpow2.f32 %v1455_v2  ;;  %v1439_v58 = vsub.f32 %v3554_v14, %v1378_v16 }
 0x28b   : > { %v3834_v6 = vpop.eup %3254  ;;  %v1459_v60 = vmul.f32 1.442695, %v1439_v58  ;;  %v1403_v36 = vpop.permute.xlu0 %1402 }
 0x28c   : > { %v1444_v9 = vsub.f32 %v3568_v21, %v1403_v36  ;;  %v1393_v15 = vpop.permute.xlu1 %1392  ;;  %v1524_v13 = vsel %vm1245_vm3, %v3834_v6, 0.0 }
 0x28d   : > { %3260 = vpow2.f32 %v1459_v60  ;;  %v1442_v33 = vsub.f32 %v3560_v17, %v1393_v15  ;;  %1525 = vadd.xlane.f32.xlu1 %v1524_v13 }
 0x28e   : > { %v1469_v10 = vmul.f32 1.442695, %v1444_v9 }
 0x28f   : > { %v3840_v61 = vpop.eup %3256  ;;  %v1465_v2 = vmul.f32 1.442695, %v1442_v33  ;;  %v1413_v41 = vpop.permute.xlu0 %1412 }
 0x290   : > { %v1446_v14 = vsub.f32 %v3576_v25, %v1413_v41  ;;  %v1388_v16 = vpop.permute.xlu1 %1387  ;;  %v1530_v58 = vsel %vm1245_vm3, %v3840_v61, 0.0 }
 0x291   : > { %3262 = vpow2.f32 %v1465_v2  ;;  %v1441_v21 = vsub.f32 %v3562_v18, %v1388_v16  ;;  %1531 = vadd.xlane.f32.xlu0 %v1530_v58 }
 0x292   : > { %3264 = vpow2.f32 %v1469_v10  ;;  %v1473_v36 = vmul.f32 1.442695, %v1446_v14 }
 0x293   : > { %v3259_v60 = vpop.eup %3258  ;;  %v1463_v17 = vmul.f32 1.442695, %v1441_v21 }
 0x294   : > { %3002 = vmatprep.mubr.msk.f32.mxu1 %vm1241_vm4, %v3259_v60  ;;  %v1398_v50 = vpop.permute.xlu1 %1397  ;;  %v1521_v27 = vsel %vm1241_vm4, %v3259_v60, 0.0 }
 0x295   : > { %3266 = vpow2.f32 %v1463_v17  ;;  %v1443_v25 = vsub.f32 %v3572_v23, %v1398_v50  ;;  %1522 = vadd.xlane.f32.xlu0 %v1521_v27 }
 0x296   : > { %3268 = vpow2.f32 %v1473_v36 }
 0x297   : > { %v3261_v45 = vpop.eup %3260  ;;  %v1467_v49 = vmul.f32 1.442695, %v1443_v25  ;;  %v1423_v9 = vpop.permute.xlu0 %1422 }
 0x298   : > { %v1448_v18 = vsub.f32 %v3634_v38, %v1423_v9  ;;  %v1408_v15 = vpop.permute.xlu1 %1407  ;;  %3009 = vmatprep.mubr.msk.f32.mxu0 %vm1241_vm4, %v3261_v45  ;;  %v1527_v13 = vsel %vm1241_vm4, %v3261_v45, 0.0 }
 0x299   : > { %3270 = vpow2.f32 %v1467_v49  ;;  %v1445_v33 = vsub.f32 %v3582_v28, %v1408_v15  ;;  %1528 = vadd.xlane.f32.xlu0 %v1527_v13 }
 0x29a   : > { %v1477_v10 = vmul.f32 1.442695, %v1448_v18 }
 0x29b   : > { %v3853_v2 = vpop.eup %3262  ;;  %v1471_v23 = vmul.f32 1.442695, %v1445_v33  ;;  %v1433_v41 = vpop.permute.xlu0 %1432 }
 0x29c   : > { %v3855_v14 = vpop.eup %3264  ;;  %3272 = vpow2.f32 %v1477_v10  ;;  %v1450_v16 = vsub.f32 %v3642_v42, %v1433_v41  ;;  %v1418_v38 = vpop.permute.xlu1 %1417  ;;  %v1536_v58 = vsel %vm1245_vm3, %v3853_v2, 0.0 }
 0x29d   : > { %3274 = vpow2.f32 %v1471_v23  ;;  %v1447_v21 = vsub.f32 %v3636_v39, %v1418_v38  ;;  %1537 = vadd.xlane.f32.xlu0 %v1536_v58  ;;  %v1542_v50 = vsel %vm1245_vm3, %v3855_v14, 0.0 }
 0x29e   : > { %v1481_v28 = vmul.f32 1.442695, %v1450_v16 }
 0x29f   : > { %v3861_v36 = vpop.eup %3266  ;;  %v1475_v60 = vmul.f32 1.442695, %v1447_v21  ;;  %v3222_v17 = vpop.permute.xlu0 %3221 }
 0x2a0   : > { %v3865_v27 = vpop.eup %3268  ;;  %3276 = vpow2.f32 %v1481_v28  ;;  %v3224_v42 = vunpack.i.h.bf16 %v3222_v17  ;;  %v3223_v25 = vunpack.i.l.bf16 %v3222_v17  ;;  %v1428_v45 = vpop.permute.xlu1 %1427  ;;  %v1533_v49 = vsel %vm1241_vm4, %v3861_v36, 0.0 }
 0x2a1   : > { %3278 = vpow2.f32 %v1475_v60  ;;  %v1449_v39 = vsub.f32 %v3644_v43, %v1428_v45  ;;  %1534 = vadd.xlane.f32.xlu1 %v1533_v49  ;;  %1543 = vadd.xlane.f32.xlu0 %v1542_v50  ;;  %v1548_v13 = vsel %vm1245_vm3, %v3865_v27, 0.0 }
 0x2a2   : > { %v3107_v9 = vpack.c.bf16 %v3224_v42, %v3223_v25 }
 0x2a3   : > { %v3271_v18 = vpop.eup %3270  ;;  %v3232_v15 = vpop.permute.xlu0 %3231  ;;  %v1479_v33 = vmul.f32 1.442695, %v1449_v39 }
 0x2a4   : > { %v3234_v10 = vunpack.i.h.bf16 %v3232_v15  ;;  %v3233_v23 = vunpack.i.l.bf16 %v3232_v15  ;;  %v3217_v41 = vpop.permute.xlu1 %3216  ;;  %3109 = vmatprep.subr.msk.bf16.mxu0 %vm3656_vm9, %v3107_v9  ;;  %v1539_v16 = vsel %vm1241_vm4, %v3271_v18, 0.0 }
 0x2a5   : > { %v3219_v38 = vunpack.i.h.bf16 %v3217_v41  ;;  %v3218_v58 = vunpack.i.l.bf16 %v3217_v41  ;;  %1540 = vadd.xlane.f32.xlu1 %v1539_v16  ;;  %1549 = vadd.xlane.f32.xlu0 %v1548_v13  ;;  %3280 = vpow2.f32 %v1479_v33 }
 0x2a6   : > { %v3273_v43 = vpop.eup %3272  ;;  %v3119_v21 = vpack.c.bf16 %v3234_v10, %v3233_v23  ;;  %3112 = vmatpush3.bf16.msk.msra.mxu0 %vm3656_vm9, %v3107_v9 }
 0x2a7   : > { %v3275_v28 = vpop.eup %3274  ;;  %v3101_v60 = vpack.c.bf16 %v3219_v38, %v3218_v58  ;;  %v3242_v17 = vpop.permute.xlu0 %3241  ;;  %v1554_v50 = vsel %vm1245_vm3, %v3273_v43, 0.0 }
 0x2a8   : > { %v3244_v42 = vunpack.i.h.bf16 %v3242_v17  ;;  %v3243_v25 = vunpack.i.l.bf16 %v3242_v17  ;;  %v3227_v45 = vpop.permute.xlu1 %3226  ;;  %3121 = vmatprep.subr.msk.bf16.mxu0 %vm3656_vm9, %v3119_v21  ;;  %v1545_v49 = vsel %vm1241_vm4, %v3275_v28, 0.0  ;;  %v1518_v17 = vsel %vm1245_vm3, %v3824_v5, 0.0 }
 0x2a9   : > { %v3229_v39 = vunpack.i.h.bf16 %v3227_v45  ;;  %v3228_v15 = vunpack.i.l.bf16 %v3227_v45  ;;  %3010 = vmatmul.mubr.msk.f32.vlgmr.msra.gmra.mrb[10].mxu0 %vm1241_vm4, %v3840_v61  ;;  %1546 = vadd.xlane.f32.xlu1 %v1545_v49  ;;  %v1323_v5 = vmul.f32 1.442695, %v1307_v37  ;;  %v4102_v37 = vsub.f32 %v3666_v51, %v3671_v54 }
 0x2aa   : > { %v3277_v9 = vpop.eup %3276  ;;  %v3131_v13 = vpack.c.bf16 %v3244_v42, %v3243_v25  ;;  %3103 = vmatprep.subr.msk.bf16.mxu1 %vm3656_vm9, %v3101_v60  ;;  %1555 = vadd.xlane.f32.xlu0 %v1554_v50  ;;  %v4106_v54 = vsub.f32 %v3695_v1, %v3709_v8  ;;  %v1341_v42 = vmul.f32 1.442695, %v4108_v31  ;;  %v4109_v1 = vsub.f32 %v3766_v55, %v3775_v22 }
 0x2ab   : > { %v3279_v33 = vpop.eup %3278  ;;  %v3113_v10 = vpack.c.bf16 %v3229_v39, %v3228_v15  ;;  %3124 = vmatpush3.bf16.msk.msra.mxu0 %vm3656_vm9, %v3119_v21  ;;  %3023 = vmatprep.mubr.msk.f32.mxu0 %vm1241_vm4, %v3271_v18  ;;  %v1560_v23 = vsel %vm1245_vm3, %v3277_v9, 0.0  ;;  %3282 = vpow2.f32 %v1323_v5  ;;  %v1329_v48 = vmul.f32 1.442695, %v4102_v37  ;;  %v1492_v37 = vld [vmem:[#allocation4 + $0x48] sm:$0x3] }
 0x2ac   : > { %3106 = vmatpush3.bf16.msk.msra.mxu1 %vm3656_vm9, %v3101_v60  ;;  %v3237_v61 = vpop.permute.xlu1 %3236  ;;  %3133 = vmatprep.subr.msk.bf16.mxu0 %vm3656_vm9, %v3131_v13  ;;  %v1551_v41 = vsel %vm1241_vm4, %v3279_v33, 0.0  ;;  %v1347_v8 = vmul.f32 1.442695, %v4109_v1  ;;  %v4112_v55 = vsub.f32 %v3764_v53, %v3770_v63  ;;  %v1493_v1 = vld [vmem:[#allocation4 + $0x50] sm:$0xff] }
 0x2ad   : > { %v3239_v16 = vunpack.i.h.bf16 %v3237_v61  ;;  %v3238_v38 = vunpack.i.l.bf16 %v3237_v61  ;;  %1552 = vadd.xlane.f32.xlu1 %v1551_v41  ;;  %3115 = vmatprep.subr.msk.bf16.mxu1 %vm3656_vm9, %v3113_v10  ;;  %v1488_v41 = vld [vmem:[#allocation4 + $0x28] sm:$0x3] }
 0x2ae   : > { %3024 = vmatmul.mubr.msk.f32.vlgmr.msra.gmra.mrb[12].mxu0 %vm1241_vm4, %v3855_v14  ;;  %1561 = vadd.xlane.f32.xlu0 %v1560_v23  ;;  %v1349_v22 = vmul.f32 1.442695, %v4112_v55  ;;  %v1495_v55 = vld [vmem:[#allocation4 + $0x60] sm:$0xff] }
 0x2af   : > { %v3125_v18 = vpack.c.bf16 %v3239_v16, %v3238_v38  ;;  %3003 = vmatmul.mubr.msk.f32.vlgmr.msra.gmra.mrb[8].mxu1 %vm1241_vm4, %v3834_v6  ;;  %3136 = vmatpush3.bf16.msk.msra.mxu0 %vm3656_vm9, %v3131_v13  ;;  %v1515_v6 = vsel %vm1241_vm4, %v3820_v3, 0.0  ;;  %v3281_v14 = vpop.eup %3280 }
 0x2b0   : > { %3037 = vmatprep.mubr.msk.f32.mxu0 %vm1241_vm4, %v3279_v33  ;;  %3118 = vmatpush3.bf16.msk.msra.mxu1 %vm3656_vm9, %v3113_v10  ;;  %v3247_v58 = vpop.permute.xlu1 %3246  ;;  %v1557_v3 = vsel %vm1241_vm4, %v3281_v14, 0.0  ;;  %v1486_v10 = vld [vmem:[#allocation4 + $0x18] sm:$0x3] }
 0x2b1   : > { %3016 = vmatprep.mubr.msk.f32.mxu1 %vm1241_vm4, %v3861_v36  ;;  %v3249_v21 = vunpack.i.h.bf16 %v3247_v58  ;;  %v3248_v60 = vunpack.i.l.bf16 %v3247_v58  ;;  %3127 = vmatprep.subr.msk.bf16.mxu1 %vm3656_vm9, %v3125_v18  ;;  %v1485_v58 = vld [vmem:[#allocation4 + $0x10] sm:$0xff] }
 0x2b2   : > { %3038 = vmatmul.mubr.msk.f32.vlgmr.msra.gmra.mrb[14].mxu0 %vm1241_vm4, %v3273_v43  ;;  %1516 = vadd.xlane.f32.xlu1 %v1515_v6  ;;  %v4100_v43 = vsub.f32 %v3668_v52, %v3674_v56  ;;  %v4104_v52 = vsub.f32 %v3676_v57, %v3690_v62  ;;  %v4107_v62 = vsub.f32 %v3741_v35, %v3752_v46 }
 0x2b3   : > { %v3137_v50 = vpack.c.bf16 %v3249_v21, %v3248_v60  ;;  %3017 = vmatmul.mubr.msk.f32.vlgmr.msra.gmra.mrb[10].mxu1 %vm1241_vm4, %v3853_v2  ;;  %1519 = vadd.xlane.f32.xlu0 %v1518_v17  ;;  %v4099_v2 = vsub.f32 %v3578_v26, %v3589_v32  ;;  %v4103_v26 = vsub.f32 %v3702_v4, %v3712_v12  ;;  %v1337_v4 = vmul.f32 1.442695, %v4106_v54  ;;  %v1494_v54 = vld [vmem:[#allocation4 + $0x58] sm:$0x3] }
 0x2b4   : > { %3130 = vmatpush3.bf16.msk.msra.mxu1 %vm3656_vm9, %v3125_v18  ;;  %3030 = vmatprep.mubr.msk.f32.mxu1 %vm1241_vm4, %v3275_v28  ;;  %v1333_v56 = vmul.f32 1.442695, %v4104_v52  ;;  %v1343_v12 = vmul.f32 1.442695, %v4107_v62  ;;  %v4110_v35 = vsub.f32 %v3731_v30, %v3749_v44 }
 0x2b5   : > { %3139 = vmatprep.subr.msk.bf16.mxu1 %vm3656_vm9, %v3137_v50  ;;  %v1325_v36 = vmul.f32 1.442695, %v4099_v2  ;;  %v1335_v32 = vmul.f32 1.442695, %v4103_v26  ;;  %v3949_v28 = vpop.eup %3282  ;;  %v1490_v2 = vld [vmem:[#allocation4 + $0x38] sm:$0x3] }
 0x2b6   : > { %1558 = vadd.xlane.f32.xlu1 %v1557_v3  ;;  %v1345_v46 = vmul.f32 1.442695, %v4110_v35 }
 0x2b7   : > { %3031 = vmatmul.mubr.msk.f32.vlgmr.msra.gmra.mrb[12].mxu1 %vm1241_vm4, %v3865_v27  ;;  %v1327_v27 = vmul.f32 1.442695, %v4100_v43  ;;  %3284 = vpow2.f32 %v1325_v36 }
 0x2b8   : > { %3142 = vmatpush3.bf16.msk.msra.mxu1 %vm3656_vm9, %v3137_v50  ;;  %3044 = vmatprep.mubr.msk.f32.mxu1 %vm1241_vm4, %v3281_v14  ;;  %v1487_v14 = vld [vmem:[#allocation4 + $0x20] sm:$0xff] }
 0x2b9   : > { %3286 = vpow2.f32 %v1327_v27 }
 0x2ba   : > { %3288 = vpow2.f32 %v1331_v34  ;;  %v1489_v34 = vld [vmem:[#allocation4 + $0x30] sm:$0xff] }
 0x2bb   : > { %3045 = vmatmul.mubr.msk.f32.vlgmr.msra.gmra.mrb[14].mxu1 %vm1241_vm4, %v3277_v9  ;;  %3290 = vpow2.f32 %v1329_v48 }
 0x2bc   : > { %3292 = vpow2.f32 %v1335_v32 }
 0x2bd   : > { %3294 = vpow2.f32 %v1333_v56 }
 0x2be   : > { %3296 = vpow2.f32 %v1339_v0  ;;  %v1491_v0 = vld [vmem:[#allocation4 + $0x40] sm:$0xff] }
 0x2bf   : > { %3298 = vpow2.f32 %v1337_v4 }
 0x2c0   : > { %3300 = vpow2.f32 %v1343_v12 }
 0x2c1   : > { %v3955_v51 = vpop.eup %3284  ;;  %3302 = vpow2.f32 %v1341_v42 }
 0x2c2   : > { %3304 = vpow2.f32 %v1347_v8 }
 0x2c3   : > { %v3287_v57 = vpop.eup %3286  ;;  %3306 = vpow2.f32 %v1345_v46  ;;  %v1496_v46 = vld [vmem:[#allocation4 + $0x68] sm:$0x3] }
 0x2c4   : > { %v3289_v20 = vpop.eup %3288  ;;  %3308 = vpow2.f32 %v1351_v24  ;;  %v1501_v60 = vmul.f32 %v3287_v57, %v1485_v58 }
 0x2c5   : > { %v3291_v25 = vpop.eup %3290  ;;  %3310 = vpow2.f32 %v1349_v22  ;;  %v1503_v3 = vmul.f32 %v3289_v20, %v1487_v14 }
 0x2c6   : > { %v3970_v45 = vpop.eup %3292  ;;  %3312 = vpow2.f32 %v1353_v40  ;;  %v1502_v23 = vmul.f32 %v3291_v25, %v1486_v10  ;;  %v1498_v40 = vld [vmem:[#allocation4 + $0x78] sm:$0x3] }
 0x2c7   : > { %2280 = vperm.xlu1 %3213, %v3949_v28   ;;  %v3295_v49 = vpop.eup %3294  ;;  %v1505_v32 = vmul.f32 %v3970_v45, %v1489_v34 }
 0x2c8   : > { %v3979_v39 = vpop.eup %3296  ;;  %v1504_v38 = vmul.f32 %v3295_v49, %v1488_v41 }
 0x2c9   : > { %2285 = vperm.xlu0 %3214, %v3955_v51   ;;  %v3299_v30 = vpop.eup %3298 }
 0x2ca   : > { %v3985_v44 = vpop.eup %3300  ;;  %v1506_v27 = vmul.f32 %v3299_v30, %v1490_v2 }
 0x2cb   : > { %2290 = vperm.xlu1 %3213, %v3287_v57   ;;  %v3303_v15 = vpop.eup %3302  ;;  %v1509_v19 = vmul.f32 %v3985_v44, %v1493_v1 }
 0x2cc   : > { %v3991_v9 = vpop.eup %3304  ;;  %v1508_v52 = vmul.f32 %v3303_v15, %v1492_v37 }
 0x2cd   : > { %2300 = vperm.xlu0 %3214, %v3289_v20   ;;  %v3307_v53 = vpop.eup %3306  ;;  %v1507_v20 = vmul.f32 %v3979_v39, %v1491_v0 }
 0x2ce   : > { %v3994_v63 = vpop.eup %3308  ;;  %v1510_v31 = vmul.f32 %v3307_v53, %v1494_v54 }
 0x2cf   : > { %2295 = vperm.xlu1 %3213, %v3291_v25   ;;  %v3997_v13 = vpop.eup %3310 }
 0x2d0   : > { %v4000_v11 = vpop.eup %3312 }
 0x2d1   : > { %2310 = vperm.xlu0 %3214, %v3970_v45  }
 0x2d3   : > { %2305 = vperm.xlu1 %3213, %v3295_v49  }
 0x2d5   : > { %2320 = vperm.xlu0 %3214, %v3979_v39   ;;  %v1512_v39 = vmul.f32 %v3997_v13, %v1496_v46 }
 0x2d7   : > { %2315 = vperm.xlu1 %3213, %v3299_v30  }
 0x2d9   : > { %2330 = vperm.xlu0 %3214, %v3985_v44  }
 0x2db   : > { %2325 = vperm.xlu1 %3213, %v3303_v15  }
 0x2dd   : > { %2340 = vperm.xlu0 %3214, %v3991_v9  }
 0x2df   : > { %2335 = vperm.xlu1 %3213, %v3307_v53  }
 0x2e1   : > { %2350 = vperm.xlu0 %3214, %v3994_v63  }
 0x2e3   : > { %2345 = vperm.xlu1 %3213, %v3997_v13  }
 0x2e7   : > { %2355 = vperm.xlu1 %3213, %v4000_v11  }
 0x306   : > { %v4003_v7 = vpop.f32.mrb[8].mxu0 }
 0x307   : > { %v4005_v33 = vpop.f32.mrb[9].mxu0 }
 0x31a   : > { %v1526_v61 = vpop.xlane.xlu1 %1525 }
 0x31b   : > { %v1566_v16 = vadd.f32 %v1526_v61, %v1502_v23  ;;  %v1511_v23 = vmul.f32 %v3991_v9, %v1495_v55  ;;  %v1514_v61 = vmul.f32 %v4000_v11, %v1498_v40  ;;  %v2267_v55 = vld [vmem:[#allocation5 + $0x28] sm:$0x3] }
 0x31d   : > { %1584 = vst.msk [vmem:[#allocation4 + $0x18] sm:$0x3] %vm343_vm5, %v1566_v16 }
 0x31e   : > { %v1532_v18 = vpop.xlane.xlu0 %1531 }
 0x31f   : > { %v1568_v21 = vadd.f32 %v1532_v18, %v1504_v38  ;;  %v1483_v38 = vld [vmem:[#allocation4] sm:$0xff] }
 0x320   : > { %v1499_v9 = vmul.f32 %v3949_v28, %v1483_v38 }
 0x321   : > { %1586 = vst.msk [vmem:[#allocation4 + $0x28] sm:$0x3] %vm343_vm5, %v1568_v21  ;;  %v1484_v21 = vld [vmem:[#allocation4 + $0x8] sm:$0x3] }
 0x322   : > { %v1523_v6 = vpop.xlane.xlu0 %1522  ;;  %v1500_v14 = vmul.f32 %v3955_v51, %v1484_v21 }
 0x323   : > { %v1565_v17 = vadd.f32 %v1523_v6, %v1501_v60 }
 0x324   : > { %v2429_v50 = vld [vmem:[#allocation4 + $0x18] sm:$0x3] }
 0x325   : > { %3314 = vrcp.f32 %v2429_v50  ;;  %1583 = vst.msk [vmem:[#allocation4 + $0x10] sm:$0xff] %vm341_vm6, %v1565_v17  ;;  %v1497_v17 = vld [vmem:[#allocation4 + $0x70] sm:$0xff] }
 0x326   : > { %v1529_v5 = vpop.xlane.xlu0 %1528 }
 0x327   : > { %v1567_v36 = vadd.f32 %v1529_v5, %v1503_v3 }
 0x328   : > { %v2431_v43 = vld [vmem:[#allocation4 + $0x28] sm:$0x3] }
 0x329   : > { %3316 = vrcp.f32 %v2431_v43  ;;  %1585 = vst.msk [vmem:[#allocation4 + $0x20] sm:$0xff] %vm341_vm6, %v1567_v36  ;;  %v1513_v43 = vmul.f32 %v3994_v63, %v1497_v17  ;;  %v2274_v17 = vld [vmem:[#allocation5 + $0x60] sm:$0xff] }
 0x32a   : > { %v1538_v29 = vpop.xlane.xlu0 %1537 }
 0x32b   : > { %v1570_v48 = vadd.f32 %v1538_v29, %v1506_v27 }
 0x32c   : > { %v2428_v26 = vld [vmem:[#allocation4 + $0x10] sm:$0xff] }
 0x32d   : > { %1588 = vst.msk [vmem:[#allocation4 + $0x38] sm:$0x3] %vm343_vm5, %v1570_v48  ;;  %3318 = vrcp.f32 %v2428_v26  ;;  %v2262_v48 = vld [vmem:[#allocation5] sm:$0xff]  ;;  %v2263_v26 = vld [vmem:[#allocation5 + $0x8] sm:$0x3] }
 0x32e   : > { %v1535_v56 = vpop.xlane.xlu1 %1534  ;;  %v1544_v59 = vpop.xlane.xlu0 %1543 }
 0x32f   : > { %v3315_v4 = vpop.eup %3314  ;;  %v1569_v57 = vadd.f32 %v1535_v56, %v1505_v32  ;;  %v1572_v62 = vadd.f32 %v1544_v59, %v1508_v52 }
 0x330   : > { %2491 = vperm.xlu1 %3213, %v3315_v4   ;;  %v2430_v12 = vld [vmem:[#allocation4 + $0x20] sm:$0xff] }
 0x331   : > { %1587 = vst.msk [vmem:[#allocation4 + $0x30] sm:$0xff] %vm341_vm6, %v1569_v57  ;;  %3320 = vrcp.f32 %v2430_v12 }
 0x332   : > { %1590 = vst.msk [vmem:[#allocation4 + $0x48] sm:$0x3] %vm343_vm5, %v1572_v62  ;;  %v1541_v42 = vpop.xlane.xlu1 %1540  ;;  %v1550_v25 = vpop.xlane.xlu0 %1549 }
 0x333   : > { %v3317_v8 = vpop.eup %3316  ;;  %v1571_v45 = vadd.f32 %v1541_v42, %v1507_v20  ;;  %v1574_v35 = vadd.f32 %v1550_v25, %v1510_v31 }
 0x334   : > { %v2433_v49 = vld [vmem:[#allocation4 + $0x38] sm:$0x3]  ;;  %2501 = vperm.xlu1 %3213, %v3317_v8  }
 0x335   : > { %3322 = vrcp.f32 %v2433_v49  ;;  %1589 = vst.msk [vmem:[#allocation4 + $0x40] sm:$0xff] %vm341_vm6, %v1571_v45 }
 0x336   : > { %1592 = vst.msk [vmem:[#allocation4 + $0x58] sm:$0x3] %vm343_vm5, %v1574_v35  ;;  %v1547_v24 = vpop.xlane.xlu1 %1546 }
 0x337   : > { %v3319_v22 = vpop.eup %3318  ;;  %v1573_v30 = vadd.f32 %v1547_v24, %v1509_v19  ;;  %v1556_v47 = vpop.xlane.xlu0 %1555 }
 0x338   : > { %v1576_v53 = vadd.f32 %v1556_v47, %v1512_v39  ;;  %2486 = vperm.xlu0 %3214, %v3319_v22   ;;  %v2432_v10 = vld [vmem:[#allocation4 + $0x30] sm:$0xff]  ;;  %v2266_v22 = vld [vmem:[#allocation5 + $0x20] sm:$0xff] }
 0x339   : > { %v2435_v15 = vld [vmem:[#allocation4 + $0x48] sm:$0x3]  ;;  %1591 = vst.msk [vmem:[#allocation4 + $0x50] sm:$0xff] %vm341_vm6, %v1573_v30 }
 0x33a   : > { %3324 = vrcp.f32 %v2435_v15  ;;  %1594 = vst.msk [vmem:[#allocation4 + $0x68] sm:$0x3] %vm343_vm5, %v1576_v53  ;;  %v1553_v44 = vpop.xlane.xlu1 %1552 }
 0x33b   : > { %3326 = vrcp.f32 %v2432_v10  ;;  %v3321_v13 = vpop.eup %3320  ;;  %v1575_v41 = vadd.f32 %v1553_v44, %v1511_v23  ;;  %v1562_v16 = vpop.xlane.xlu0 %1561  ;;  %v2271_v10 = vld [vmem:[#allocation5 + $0x48] sm:$0x3] }
 0x33c   : > { %v1578_v58 = vadd.f32 %v1562_v16, %v1514_v61  ;;  %2496 = vperm.xlu0 %3214, %v3321_v13   ;;  %v2434_v60 = vld [vmem:[#allocation4 + $0x40] sm:$0xff]  ;;  %v2265_v61 = vld [vmem:[#allocation5 + $0x18] sm:$0x3]  ;;  %v2264_v16 = vld [vmem:[#allocation5 + $0x10] sm:$0xff] }
 0x33d   : > { %v2437_v18 = vld [vmem:[#allocation4 + $0x58] sm:$0x3]  ;;  %1593 = vst.msk [vmem:[#allocation4 + $0x60] sm:$0xff] %vm341_vm6, %v1575_v41  ;;  %v2270_v13 = vld [vmem:[#allocation5 + $0x40] sm:$0xff] }
 0x33e   : > { %3328 = vrcp.f32 %v2437_v18  ;;  %1596 = vst.msk [vmem:[#allocation4 + $0x78] sm:$0x3] %vm343_vm5, %v1578_v58 }
 0x33f   : > { %3330 = vrcp.f32 %v2434_v60  ;;  %v3323_v6 = vpop.eup %3322  ;;  %v1517_v11 = vpop.xlane.xlu1 %1516  ;;  %v2275_v60 = vld [vmem:[#allocation5 + $0x68] sm:$0x3] }
 0x340   : > { %v1563_v50 = vadd.f32 %v1517_v11, %v1499_v9  ;;  %v1520_v3 = vpop.xlane.xlu0 %1519  ;;  %2511 = vperm.xlu1 %3213, %v3323_v6   ;;  %v2436_v5 = vld [vmem:[#allocation4 + $0x50] sm:$0xff] }
 0x341   : > { %v2439_v2 = vld [vmem:[#allocation4 + $0x68] sm:$0x3]  ;;  %v1564_v36 = vadd.f32 %v1520_v3, %v1500_v14  ;;  %3332 = vrcp.f32 %v2436_v5  ;;  %v2269_v14 = vld [vmem:[#allocation5 + $0x38] sm:$0x3] }
 0x342   : > { %3334 = vrcp.f32 %v2439_v2  ;;  %1580 = vst.msk [vmem:[#allocation4] sm:$0xff] %vm341_vm6, %v1563_v50  ;;  %v2268_v2 = vld [vmem:[#allocation5 + $0x30] sm:$0xff] }
 0x343   : > { %1582 = vst.msk [vmem:[#allocation4 + $0x8] sm:$0x3] %vm343_vm5, %v1564_v36  ;;  %v1559_v28 = vpop.xlane.xlu1 %1558 }
 0x344   : > { %v3325_v27 = vpop.eup %3324  ;;  %v1577_v34 = vadd.f32 %v1559_v28, %v1513_v43  ;;  %v2438_v51 = vld [vmem:[#allocation4 + $0x60] sm:$0xff] }
 0x345   : > { %v3327_v29 = vpop.eup %3326  ;;  %2521 = vperm.xlu1 %3213, %v3325_v27   ;;  %v2441_v37 = vld [vmem:[#allocation4 + $0x78] sm:$0x3]  ;;  %3336 = vrcp.f32 %v2438_v51 }
 0x346   : > { %2506 = vperm.xlu0 %3214, %v3327_v29   ;;  %3338 = vrcp.f32 %v2441_v37  ;;  %1595 = vst.msk [vmem:[#allocation4 + $0x70] sm:$0xff] %vm341_vm6, %v1577_v34 }
 0x347   : > { %v2281_v52 = vpop.permute.xlu1 %2280 }
 0x348   : > { %v3329_v32 = vpop.eup %3328  ;;  %v2358_v63 = vmul.f32 %v2281_v52, %v2262_v48  ;;  %v2286_v59 = vpop.permute.xlu0 %2285 }
 0x349   : > { %v3331_v56 = vpop.eup %3330  ;;  %2531 = vperm.xlu1 %3213, %v3329_v32   ;;  %v2359_v0 = vmul.f32 %v2286_v59, %v2263_v26  ;;  %v2426_v42 = vld [vmem:[#allocation4] sm:$0xff]  ;;  %v2273_v26 = vld [vmem:[#allocation5 + $0x58] sm:$0x3] }
 0x34a   : > { %2516 = vperm.xlu0 %3214, %v3331_v56   ;;  %v2427_v54 = vld [vmem:[#allocation4 + $0x8] sm:$0x3]  ;;  %v2374_v4 = vadd.f32 %v2358_v63, %v4005_v33  ;;  %v2272_v63 = vld [vmem:[#allocation5 + $0x50] sm:$0xff] }
 0x34b   : > { %v3333_v57 = vpop.eup %3332  ;;  %3340 = vrcp.f32 %v2427_v54  ;;  %v2375_v62 = vadd.f32 %v4003_v7, %v2359_v0  ;;  %v2291_v8 = vpop.permute.xlu1 %2290 }
 0x34c   : > { %v3335_v12 = vpop.eup %3334  ;;  %2390 = vst.msk [vmem:[#allocation5] sm:$0xff] %vm375_vm0, %v2374_v4  ;;  %v2301_v35 = vpop.permute.xlu0 %2300  ;;  %v2360_v11 = vmul.f32 %v2291_v8, %v2264_v16 }
 0x34d   : > { %v2440_v20 = vld [vmem:[#allocation4 + $0x70] sm:$0xff]  ;;  %2392 = vst.msk [vmem:[#allocation5 + $0x8] sm:$0x3] %vm377_vm2, %v2375_v62  ;;  %2541 = vperm.xlu1 %3213, %v3335_v12   ;;  %v2362_v15 = vmul.f32 %v2301_v35, %v2266_v22  ;;  %v2277_v12 = vld [vmem:[#allocation5 + $0x78] sm:$0x3] }
 0x34e   : > { %2526 = vperm.xlu0 %3214, %v3333_v57   ;;  %3342 = vrcp.f32 %v2440_v20 }
 0x34f   : > { %v3337_v31 = vpop.eup %3336  ;;  %3344 = vrcp.f32 %v2426_v42  ;;  %v2296_v45 = vpop.permute.xlu1 %2295  ;;  %v2276_v42 = vld [vmem:[#allocation5 + $0x70] sm:$0xff] }
 0x350   : > { %v3339_v25 = vpop.eup %3338  ;;  %v2311_v49 = vpop.permute.xlu0 %2310  ;;  %v2361_v58 = vmul.f32 %v2296_v45, %v2265_v61 }
 0x351   : > { %2551 = vperm.xlu1 %3213, %v3339_v25   ;;  %v2364_v48 = vmul.f32 %v2311_v49, %v2268_v2 }
 0x352   : > { %2536 = vperm.xlu0 %3214, %v3337_v31  }
 0x353   : > { %v2306_v46 = vpop.permute.xlu1 %2305 }
 0x354   : > { %v2321_v24 = vpop.permute.xlu0 %2320  ;;  %v2363_v47 = vmul.f32 %v2306_v46, %v2267_v55 }
 0x355   : > { %v3341_v33 = vpop.eup %3340  ;;  %v2366_v21 = vmul.f32 %v2321_v24, %v2270_v13 }
 0x356   : > { %2481 = vperm.xlu1 %3213, %v3341_v33  }
 0x357   : > { %v2316_v19 = vpop.permute.xlu1 %2315 }
 0x358   : > { %v3343_v1 = vpop.eup %3342  ;;  %v2331_v30 = vpop.permute.xlu0 %2330  ;;  %v2365_v34 = vmul.f32 %v2316_v19, %v2269_v14 }
 0x359   : > { %2546 = vperm.xlu0 %3214, %v3343_v1   ;;  %v3345_v7 = vpop.eup %3344  ;;  %v2368_v62 = vmul.f32 %v2331_v30, %v2272_v63 }
 0x35b   : > { %v2326_v39 = vpop.permute.xlu1 %2325 }
 0x35c   : > { %v2367_v38 = vmul.f32 %v2326_v39, %v2271_v10  ;;  %v2341_v18 = vpop.permute.xlu0 %2340 }
 0x35d   : > { %2476 = vperm.xlu0 %3214, %v3345_v7   ;;  %v2370_v51 = vmul.f32 %v2341_v18, %v2274_v17 }
 0x35f   : > { %v2336_v40 = vpop.permute.xlu1 %2335 }
 0x360   : > { %v2369_v57 = vmul.f32 %v2336_v40, %v2273_v26  ;;  %v2351_v25 = vpop.permute.xlu0 %2350 }
 0x361   : > { %v2372_v45 = vmul.f32 %v2351_v25, %v2276_v42 }
 0x363   : > { %v2346_v9 = vpop.permute.xlu1 %2345 }
 0x364   : > { %v2371_v28 = vmul.f32 %v2346_v9, %v2275_v60 }
 0x367   : > { %v2356_v20 = vpop.permute.xlu1 %2355 }
 0x368   : > { %v2373_v8 = vmul.f32 %v2356_v20, %v2277_v12 }
 0x37c   : > { %v3011_v53 = vpop.f32.mrb[10].mxu0 }
 0x37d   : > { %v2379_v23 = vadd.f32 %v3011_v53, %v2363_v47  ;;  %v1838_v44 = vpop.f32.mrb[11].mxu0 }
 0x37e   : > { %v2378_v41 = vadd.f32 %v2362_v15, %v1838_v44 }
 0x37f   : > { %2396 = vst.msk [vmem:[#allocation5 + $0x28] sm:$0x3] %vm377_vm2, %v2379_v23 }
 0x380   : > { %2395 = vst.msk [vmem:[#allocation5 + $0x20] sm:$0xff] %vm375_vm0, %v2378_v41 }
 0x381   : > { %v3025_v6 = vpop.f32.mrb[12].mxu0 }
 0x382   : > { %v2383_v50 = vadd.f32 %v3025_v6, %v2367_v38  ;;  %v3004_v3 = vpop.f32.mrb[8].mxu1  ;;  %v2004_v5 = vpop.f32.mrb[13].mxu0 }
 0x383   : > { %v2377_v36 = vadd.f32 %v3004_v3, %v2361_v58  ;;  %v2382_v43 = vadd.f32 %v2366_v21, %v2004_v5  ;;  %v1755_v27 = vpop.f32.mrb[9].mxu1 }
 0x384   : > { %2400 = vst.msk [vmem:[#allocation5 + $0x48] sm:$0x3] %vm377_vm2, %v2383_v50  ;;  %v2376_v29 = vadd.f32 %v2360_v11, %v1755_v27 }
 0x385   : > { %2394 = vst.msk [vmem:[#allocation5 + $0x18] sm:$0x3] %vm377_vm2, %v2377_v36  ;;  %v3039_v37 = vpop.f32.mrb[14].mxu0 }
 0x386   : > { %2399 = vst.msk [vmem:[#allocation5 + $0x40] sm:$0xff] %vm375_vm0, %v2382_v43  ;;  %2393 = vst.msk [vmem:[#allocation5 + $0x10] sm:$0xff] %vm375_vm0, %v2376_v29  ;;  %v2387_v32 = vadd.f32 %v3039_v37, %v2371_v28  ;;  %v3018_v52 = vpop.f32.mrb[10].mxu1  ;;  %v2170_v56 = vpop.f32.mrb[15].mxu0  ;;  %v2463_v30 = vld [vmem:[#allocation5 + $0x28] sm:$0x3] }
 0x387   : > { %v2381_v59 = vadd.f32 %v3018_v52, %v2365_v34  ;;  %v2386_v0 = vadd.f32 %v2370_v51, %v2170_v56  ;;  %v1921_v54 = vpop.f32.mrb[11].mxu1  ;;  %v2462_v23 = vld [vmem:[#allocation5 + $0x20] sm:$0xff] }
 0x388   : > { %2404 = vst.msk [vmem:[#allocation5 + $0x68] sm:$0x3] %vm377_vm2, %v2387_v32  ;;  %v2380_v4 = vadd.f32 %v2364_v48, %v1921_v54 }
 0x389   : > { %2398 = vst.msk [vmem:[#allocation5 + $0x38] sm:$0x3] %vm377_vm2, %v2381_v59 }
 0x38a   : > { %2403 = vst.msk [vmem:[#allocation5 + $0x60] sm:$0xff] %vm375_vm0, %v2386_v0  ;;  %2397 = vst.msk [vmem:[#allocation5 + $0x30] sm:$0xff] %vm375_vm0, %v2380_v4  ;;  %v3032_v31 = vpop.f32.mrb[12].mxu1 }
 0x38b   : > { %v2385_v33 = vadd.f32 %v3032_v31, %v2369_v57  ;;  %v2087_v1 = vpop.f32.mrb[13].mxu1  ;;  %v2467_v38 = vld [vmem:[#allocation5 + $0x48] sm:$0x3] }
 0x38c   : > { %v2384_v7 = vadd.f32 %v2368_v62, %v2087_v1  ;;  %v2461_v24 = vld [vmem:[#allocation5 + $0x18] sm:$0x3]  ;;  %v2459_v31 = vld [vmem:[#allocation5 + $0x8] sm:$0x3] }
 0x38d   : > { %2402 = vst.msk [vmem:[#allocation5 + $0x58] sm:$0x3] %vm377_vm2, %v2385_v33  ;;  %v2460_v40 = vld [vmem:[#allocation5 + $0x10] sm:$0xff]  ;;  %v2466_v17 = vld [vmem:[#allocation5 + $0x40] sm:$0xff] }
 0x38e   : > { %2401 = vst.msk [vmem:[#allocation5 + $0x50] sm:$0xff] %vm375_vm0, %v2384_v7  ;;  %v3046_v35 = vpop.f32.mrb[14].mxu1 }
 0x38f   : > { %v2389_v46 = vadd.f32 %v3046_v35, %v2373_v8  ;;  %v2253_v49 = vpop.f32.mrb[15].mxu1  ;;  %v2471_v5 = vld [vmem:[#allocation5 + $0x68] sm:$0x3] }
 0x390   : > { %v2388_v19 = vadd.f32 %v2372_v45, %v2253_v49  ;;  %v2465_v61 = vld [vmem:[#allocation5 + $0x38] sm:$0x3]  ;;  %v2458_v49 = vld [vmem:[#allocation5] sm:$0xff] }
 0x391   : > { %2406 = vst.msk [vmem:[#allocation5 + $0x78] sm:$0x3] %vm377_vm2, %v2389_v46  ;;  %v2464_v58 = vld [vmem:[#allocation5 + $0x30] sm:$0xff]  ;;  %v2470_v51 = vld [vmem:[#allocation5 + $0x60] sm:$0xff] }
 0x392   : > { %2405 = vst.msk [vmem:[#allocation5 + $0x70] sm:$0xff] %vm375_vm0, %v2388_v19 }
 0x394   : > { %v2469_v9 = vld [vmem:[#allocation5 + $0x58] sm:$0x3] }
 0x395   : > { %v2468_v2 = vld [vmem:[#allocation5 + $0x50] sm:$0xff] }
 0x398   : > { %v2473_v28 = vld [vmem:[#allocation5 + $0x78] sm:$0x3] }
 0x399   : > { %v2472_v26 = vld [vmem:[#allocation5 + $0x70] sm:$0xff] }
 0x3af   : > { %v2492_v39 = vpop.permute.xlu1 %2491 }
 0x3b0   : > { %v2557_v55 = vmul.f32 %v2492_v39, %v2461_v24 }
 0x3b2   : > { %2574 = vrot.lane.b32.xlu1 %v2557_v55, %s3376_s29 }
 0x3b3   : > { %v2502_v22 = vpop.permute.xlu1 %2501 }
 0x3b4   : > { %v2559_v47 = vmul.f32 %v2502_v22, %v2463_v30 }
 0x3b6   : > { %2582 = vrot.lane.b32.xlu1 %v2559_v47, %s3375_s28 }
 0x3b7   : > { %v2487_v15 = vpop.permute.xlu0 %2486 }
 0x3b8   : > { %v2556_v53 = vmul.f32 %v2487_v15, %v2460_v40 }
 0x3ba   : > { %2572 = vrot.lane.b32.xlu0 %v2556_v53, %s3376_s29 }
 0x3bb   : > { %v2497_v10 = vpop.permute.xlu0 %2496 }
 0x3bc   : > { %v2558_v44 = vmul.f32 %v2497_v10, %v2462_v23 }
 0x3be   : > { %2580 = vrot.lane.b32.xlu0 %v2558_v44, %s3375_s28 }
 0x3bf   : > { %v2512_v13 = vpop.permute.xlu1 %2511 }
 0x3c0   : > { %v2561_v41 = vmul.f32 %v2512_v13, %v2465_v61 }
 0x3c2   : > { %2590 = vrot.lane.b32.xlu1 %v2561_v41, %s3374_s27 }
 0x3c4   : > { %v2522_v16 = vpop.permute.xlu1 %2521 }
 0x3c5   : > { %v2563_v18 = vmul.f32 %v2522_v16, %v2467_v38  ;;  %v2507_v21 = vpop.permute.xlu0 %2506 }
 0x3c6   : > { %v2560_v60 = vmul.f32 %v2507_v21, %v2464_v58 }
 0x3c7   : > { %2598 = vrot.lane.b32.xlu1 %v2563_v18, %s3373_s26 }
 0x3c8   : > { %2588 = vrot.lane.b32.xlu0 %v2560_v60, %s3374_s27  ;;  %v2532_v6 = vpop.permute.xlu1 %2531 }
 0x3c9   : > { %v2565_v11 = vmul.f32 %v2532_v6, %v2469_v9  ;;  %v2517_v14 = vpop.permute.xlu0 %2516 }
 0x3ca   : > { %v2562_v50 = vmul.f32 %v2517_v14, %v2466_v17 }
 0x3cb   : > { %2606 = vrot.lane.b32.xlu1 %v2565_v11, %s3372_s25 }
 0x3cc   : > { %2596 = vrot.lane.b32.xlu0 %v2562_v50, %s3373_s26  ;;  %v2542_v3 = vpop.permute.xlu1 %2541 }
 0x3cd   : > { %v2527_v36 = vpop.permute.xlu0 %2526  ;;  %v2567_v43 = vmul.f32 %v2542_v3, %v2471_v5 }
 0x3ce   : > { %v2564_v27 = vmul.f32 %v2527_v36, %v2468_v2 }
 0x3cf   : > { %2614 = vrot.lane.b32.xlu1 %v2567_v43, %s3371_s24 }
 0x3d0   : > { %2604 = vrot.lane.b32.xlu0 %v2564_v27, %s3372_s25  ;;  %v2552_v29 = vpop.permute.xlu1 %2551 }
 0x3d1   : > { %v2537_v34 = vpop.permute.xlu0 %2536  ;;  %v2569_v37 = vmul.f32 %v2552_v29, %v2473_v28 }
 0x3d2   : > { %v2566_v48 = vmul.f32 %v2537_v34, %v2470_v51 }
 0x3d3   : > { %2622 = vrot.lane.b32.xlu1 %v2569_v37, %s3370_s23 }
 0x3d4   : > { %2612 = vrot.lane.b32.xlu0 %v2566_v48, %s3371_s24 }
 0x3d5   : > { %v2482_v56 = vpop.permute.xlu1 %2481 }
 0x3d6   : > { %v2555_v25 = vmul.f32 %v2482_v56, %v2459_v31 }
 0x3d8   : > { %v2547_v32 = vpop.permute.xlu0 %2546 }
 0x3d9   : > { %v2568_v52 = vmul.f32 %v2547_v32, %v2472_v26 }
 0x3db   : > { %2620 = vrot.lane.b32.xlu0 %v2568_v52, %s3370_s23 }
 0x3dc   : > { %v2477_v59 = vpop.permute.xlu0 %2476 }
 0x3dd   : > { %v2554_v39 = vmul.f32 %v2477_v59, %v2458_v49 }
 0x424   : > { %v2575_v63 = vpop.permute.xlu1 %2574 }
 0x425   : > { %v2627_v33 = vsel %vm375_vm0, %v2555_v25, %v2575_v63 }
 0x428   : > { %v2583_v54 = vpop.permute.xlu1 %2582 }
 0x429   : > { %v2630_v1 = vsel %vm2628_vm10, %v2627_v33, %v2583_v54 }
 0x42c   : > { %v2573_v0 = vpop.permute.xlu0 %2572 }
 0x42d   : > { %v2626_v22 = vsel %vm375_vm0, %v2554_v39, %v2573_v0 }
 0x430   : > { %v2581_v57 = vpop.permute.xlu0 %2580 }
 0x431   : > { %v2629_v30 = vsel %vm2628_vm10, %v2626_v22, %v2581_v57 }
 0x434   : > { %v2591_v4 = vpop.permute.xlu1 %2590 }
 0x435   : > { %v2633_v8 = vsel %vm2631_vm11, %v2630_v1, %v2591_v4 }
 0x439   : > { %v2599_v62 = vpop.permute.xlu1 %2598 }
 0x43a   : > { %v2589_v12 = vpop.permute.xlu0 %2588  ;;  %v2636_v45 = vsel %vm2634_vm12, %v2633_v8, %v2599_v62 }
 0x43b   : > { %v2632_v40 = vsel %vm2631_vm11, %v2629_v30, %v2589_v12 }
 0x43d   : > { %v2607_v20 = vpop.permute.xlu1 %2606 }
 0x43e   : > { %v2597_v42 = vpop.permute.xlu0 %2596  ;;  %v2639_v46 = vsel %vm2637_vm13, %v2636_v45, %v2607_v20 }
 0x43f   : > { %v2635_v15 = vsel %vm2634_vm12, %v2632_v40, %v2597_v42 }
 0x441   : > { %v2615_v7 = vpop.permute.xlu1 %2614 }
 0x442   : > { %v2605_v35 = vpop.permute.xlu0 %2604  ;;  %v2642_v19 = vsel %vm2640_vm14, %v2639_v46, %v2615_v7 }
 0x443   : > { %v2638_v53 = vsel %vm2637_vm13, %v2635_v15, %v2605_v35 }
 0x445   : > { %v2623_v24 = vpop.permute.xlu1 %2622 }
 0x446   : > { %v2645_v55 = vsel %vm2643_vm15, %v2642_v19, %v2623_v24  ;;  %v2613_v47 = vpop.permute.xlu0 %2612 }
 0x447   : > { %2647 = vst [vmem:[%s335_s8 + $0x8] sm:$0x3] %v2645_v55  ;;  %v2641_v10 = vsel %vm2640_vm14, %v2638_v53, %v2613_v47 }
 0x44d   : > { %v2621_v23 = vpop.permute.xlu0 %2620 }
 0x44e   : > { %v2644_v44 = vsel %vm2643_vm15, %v2641_v10, %v2621_v23 }
 0x44f   : > { %2646 = vst [vmem:[%s335_s8] sm:$0xff] %v2644_v44 }
 0x450 PF: > { %s13_s14 = sadd.s32 1, %s3368_s14   ;;  %s4114_s12 = smov %s3364_s13 }
 0x451   : > { %p10_p5 = scmp.ge.s32.totalorder %s13_s14, 4   ;;  %s4115_s13 = smov %s4117_s15 }
 0x453   :  { %12 = sbr.rel (!%p10_p5) target bundleno = 2 (0x2), region = 76 }

</bundles_post_ra>
